<compile_context>
chip_gen: v7x
topology: tpu7x:2x2x1
jax: 0.10.0
libtpu: 0.0.40
codegen_flags: <defaults>
</compile_context>

<pallas_src>
import functools

import jax
import jax.numpy as jnp
import numpy as np
from jax import lax
from jax.experimental import pallas as pl
from jax.experimental.pallas import tpu as pltpu

EPS = 1e-5


def _round_up(v, m):
    return (v + m - 1) // m * m


def _drb_kernel(xpf_ref, mask_ref, w1_ref, g1_ref, b1_ref,
                w2_ref, g2_ref, b2_ref, wsc_ref, bsc_ref,
                o_ref, col1_ref, col2_ref,
                *, cin_p, cout_p, offsets, center, length, inv_count,
                has_projection):
    """Whole residual block on one (Cout_p, L) lane-dense slab.

    xpf_ref : (Cin_p, L)  zero-padded input, flat padded spatial on lanes
    mask_ref: (1, L)      1.0 at valid output positions (y < H, x < W)
    w1_ref  : (Cout_p, 9*Cin_p)  w2_ref: (Cout_p, 9*Cout_p)  wsc_ref: (Cout_p, Cin_p)
    g*/b*   : (Cout_p, 1) BN affine params; bsc_ref: (Cout_p, 1) shortcut bias
    col1/col2: VMEM im2col scratch (9*Cin_p, L) / (9*Cout_p, L)
    """
    xpf = xpf_ref[...]                     # (Cin_p, L) f32
    mask = mask_ref[...]                   # (1, L)     f32

    # ---- conv1: 9 lane rotations (XLU) build im2col, one MXU matmul (K=9*Cin_p)
    for t, off in enumerate(offsets):
        s = (-off) % length
        col1_ref[pl.ds(t * cin_p, cin_p), :] = (
            xpf if s == 0 else pltpu.roll(xpf, s, axis=1))
    acc1 = jnp.dot(w1_ref[...], col1_ref[...],
                   preferred_element_type=jnp.float32)          # (Cout_p, L)
    # (conv1 bias omitted: a per-channel constant cancels in training-mode BN)

    # ---- bn1 (masked batch stats) + relu; masked zeros double as conv2 padding
    m1 = jnp.sum(acc1 * mask, axis=1, keepdims=True) * inv_count
    c1 = acc1 - m1
    v1 = jnp.sum(c1 * c1 * mask, axis=1, keepdims=True) * inv_count
    y1 = c1 * (lax.rsqrt(v1 + EPS) * g1_ref[...]) + b1_ref[...]
    y1 = jnp.maximum(y1, 0.0) * mask                             # (Cout_p, L)

    # ---- conv2: "re-pad + tap shift" fused into one roll per tap
    for t, off in enumerate(offsets):
        s = (center - off) % length
        col2_ref[pl.ds(t * cout_p, cout_p), :] = (
            y1 if s == 0 else pltpu.roll(y1, s, axis=1))
    acc2 = jnp.dot(w2_ref[...], col2_ref[...],
                   preferred_element_type=jnp.float32)           # (Cout_p, L)
    # (conv2 bias omitted: cancels in BN)

    # ---- bn2
    m2 = jnp.sum(acc2 * mask, axis=1, keepdims=True) * inv_count
    c2 = acc2 - m2
    v2 = jnp.sum(c2 * c2 * mask, axis=1, keepdims=True) * inv_count
    y2 = c2 * (lax.rsqrt(v2 + EPS) * g2_ref[...]) + b2_ref[...]

    # ---- shortcut: x in output coordinates == the centre tap of conv1's im2col
    x_ctr = col1_ref[pl.ds(4 * cin_p, cin_p), :]                 # (Cin_p, L)
    if has_projection:
        sc = jnp.dot(wsc_ref[...], x_ctr,
                     preferred_element_type=jnp.float32) + bsc_ref[...]
    else:
        sc = x_ctr                       # identity shortcut: no matmul, no bias

    o_ref[...] = jnp.maximum(y2 + sc, 0.0)


@jax.jit
def dilated_residual_block(x_nchw, params):
    """Forward pass matching the PyTorch DilatedResidualBlock.

    x_nchw: (N, Cin, H, W) float32.  Returns (N, Cout, H, W) float32.
    """
    (w1, b1, g1, be1, w2, b2, g2, be2, wsc, bsc) = params
    del b1, b2  # conv biases cancel in training-mode BN (kept in the reference)
    N, Cin, H, W = x_nchw.shape
    Cout = w1.shape[-1]
    Cin_p = _round_up(Cin, 8)            # 8-aligned sublane tiles in-kernel
    Cout_p = _round_up(Cout, 8)

    Hp = H + 4                           # rows incl. 2 top + 2 bottom zero pad
    Ws = _round_up(W + 4, 32)            # padded row stride (>= 4 zero columns)
    L0 = N * Hp * Ws
    L = _round_up(L0, 128)               # lane dim multiple of 128 (aligned vregs)

    # One fused XLA copy: zero-pad and relayout to (Cin_p, L): channels on
    # sublanes, flat padded spatial on lanes.  Pixel (n,c,y,x) -> lane
    # n*Hp*Ws + (y+2)*Ws + x.  The >= 4 zero columns at the end of each row act
    # as both the right and (via flat adjacency / cyclic roll) the left padding.
    xp = jnp.pad(x_nchw, ((0, 0), (0, 0), (2, 2), (0, Ws - W)))
    xpf = jnp.transpose(xp, (1, 0, 2, 3)).reshape(Cin, L0)
    xpf = jnp.pad(xpf, ((0, Cin_p - Cin), (0, L - L0)))

    # Validity mask of output lanes (q = n*Hp*Ws + y*Ws + x, y < H, x < W).
    m = np.zeros((N, Hp, Ws), np.float32)
    m[:, :H, :W] = 1.0
    mask_np = np.zeros((1, L), np.float32)
    mask_np[0, :L0] = m.reshape(-1)
    mask = jnp.asarray(mask_np)

    # Weights in matmul layout, zero-padded to the aligned channel counts.
    w1t = jnp.pad(w1, ((0, 0), (0, 0), (0, Cin_p - Cin), (0, Cout_p - Cout))
                  ).reshape(9 * Cin_p, Cout_p).T                 # (Cout_p, 9*Cin_p)
    w2t = jnp.pad(w2, ((0, 0), (0, 0), (0, Cout_p - Cout), (0, Cout_p - Cout))
                  ).reshape(9 * Cout_p, Cout_p).T                # (Cout_p, 9*Cout_p)
    wsct = jnp.pad(wsc, ((0, Cin_p - Cin), (0, Cout_p - Cout))).T  # (Cout_p, Cin_p)

    def pc(v, fill):
        return jnp.pad(v, (0, Cout_p - Cout),
                       constant_values=fill).reshape(Cout_p, 1)

    g1p, be1p = pc(g1, 1.0), pc(be1, 0.0)
    g2p, be2p = pc(g2, 1.0), pc(be2, 0.0)
    bscp = pc(bsc, 0.0)

    # Dilation-2 tap offsets in the flat layout: output lane q reads input lane
    # q + off, off = 2*ky*Ws + 2*kx - 2.  The centre tap (ky=kx=1) is 2*Ws.
    offsets = tuple(2 * ky * Ws + 2 * kx - 2
                    for ky in range(3) for kx in range(3))

    kernel = functools.partial(
        _drb_kernel, cin_p=Cin_p, cout_p=Cout_p, offsets=offsets,
        center=2 * Ws, length=L, inv_count=1.0 / float(N * H * W),
        has_projection=(Cin != Cout))

    resident = 4 * L * (10 * Cin_p + 16 * Cout_p + 16)
    vmem_limit = int(min(max(16 * 1024 * 1024, 2 * resident), 64 * 1024 * 1024))

    out_flat = pl.pallas_call(
        kernel,
        out_shape=jax.ShapeDtypeStruct((Cout_p, L), jnp.float32),
        in_specs=[pl.BlockSpec(memory_space=pltpu.MemorySpace.VMEM)] * 10,
        out_specs=pl.BlockSpec(memory_space=pltpu.MemorySpace.VMEM),
        scratch_shapes=[pltpu.VMEM((9 * Cin_p, L), jnp.float32),
                        pltpu.VMEM((9 * Cout_p, L), jnp.float32)],
        compiler_params=pltpu.CompilerParams(vmem_limit_bytes=vmem_limit),
    )(xpf, mask,
      w1t, g1p, be1p,
      w2t, g2p, be2p,
      wsct, bscp)

    # Lane-dense (Cout_p, L) slab -> NCHW (tiny tensor; fused by XLA).
    out = out_flat[:Cout, :L0].reshape(Cout, N, Hp, Ws)[:, :, :H, :W]
    return jnp.transpose(out, (1, 0, 2, 3))


def init_params(key, in_channels, out_channels):
    """Deterministic init (PyTorch-style uniform bounds). Conv weights stored as
    (kh, kw, Cin, Cout); 1x1 shortcut as (Cin, Cout)."""
    ks = jax.random.split(key, 3)

    def conv_init(k, kh, kw, cin, cout):
        bound = 1.0 / np.sqrt(cin * kh * kw)
        kw_, kb_ = jax.random.split(k)
        w = jax.random.uniform(kw_, (kh, kw, cin, cout), jnp.float32, -bound, bound)
        b = jax.random.uniform(kb_, (cout,), jnp.float32, -bound, bound)
        return w, b

    w1, b1 = conv_init(ks[0], 3, 3, in_channels, out_channels)
    w2, b2 = conv_init(ks[1], 3, 3, out_channels, out_channels)

    # BatchNorm affine: gamma=1, beta=0 (PyTorch default init)
    g1 = jnp.ones((out_channels,), jnp.float32)
    be1 = jnp.zeros((out_channels,), jnp.float32)
    g2 = jnp.ones((out_channels,), jnp.float32)
    be2 = jnp.zeros((out_channels,), jnp.float32)

    if in_channels != out_channels:
        wsc4, bsc = conv_init(ks[2], 1, 1, in_channels, out_channels)
        wsc = wsc4.reshape(in_channels, out_channels)
    else:
        wsc = jnp.eye(in_channels, dtype=jnp.float32)   # unused by the kernel
        bsc = jnp.zeros((out_channels,), jnp.float32)

    return (w1, b1, g1, be1, w2, b2, g2, be2, wsc, bsc)


def reference_forward(x_nchw, params):
    """Pure-JAX (XLA) reference matching the PyTorch module, for verification."""
    (w1, b1, g1, be1, w2, b2, g2, be2, wsc, bsc) = params

    def conv(x, w, b, dil, pad):
        w_oihw = jnp.transpose(w, (3, 2, 0, 1))
        y = lax.conv_general_dilated(
            x, w_oihw, window_strides=(1, 1),
            padding=[(pad, pad), (pad, pad)], rhs_dilation=(dil, dil),
            dimension_numbers=('NCHW', 'OIHW', 'NCHW'),
            precision=lax.Precision.HIGHEST)
        return y + b.reshape(1, -1, 1, 1)

    def bn(x, g, be):
        mean = jnp.mean(x, axis=(0, 2, 3), keepdims=True)
        var = jnp.mean((x - mean) ** 2, axis=(0, 2, 3), keepdims=True)
        return (x - mean) * lax.rsqrt(var + EPS) * g.reshape(1, -1, 1, 1) \
            + be.reshape(1, -1, 1, 1)

    y = jax.nn.relu(bn(conv(x_nchw, w1, b1, 2, 2), g1, be1))
    y = bn(conv(y, w2, b2, 2, 2), g2, be2)
    wsc4 = wsc.reshape(1, 1, wsc.shape[0], wsc.shape[1])
    sc = conv(x_nchw, wsc4, bsc, 1, 0)
    return jax.nn.relu(y + sc)


def _check(in_channels, out_channels, N, H, W, seed):
    key = jax.random.PRNGKey(seed)
    kx, kp = jax.random.split(key)
    x = jax.random.normal(kx, (N, in_channels, H, W), jnp.float32)
    params = init_params(kp, in_channels, out_channels)

    out = jax.block_until_ready(dilated_residual_block(x, params))
    ref = jax.block_until_ready(reference_forward(x, params))

    assert out.shape == (N, out_channels, H, W)
    err = float(jnp.max(jnp.abs(out - ref)))
    assert jnp.allclose(out, ref, atol=1e-3, rtol=1e-3), \
        f"max abs err {err} (Cin={in_channels}, Cout={out_channels})"


if __name__ == "__main__":
    # projection shortcut (Cin != Cout)
    _check(in_channels=4, out_channels=8, N=2, H=16, W=16, seed=0)
    # identity shortcut specialization (Cin == Cout): no 1x1 matmul in-kernel
    _check(in_channels=8, out_channels=8, N=2, H=16, W=16, seed=0)
    print("KERNEL_OK")
</pallas_src>

<mosaic_0001>
module attributes {stable_mosaic.version = 11 : i64} {
  func.func @_drb_kernel(%arg0: memref<8x1280xf32, #tpu.memory_space<vmem>>, %arg1: memref<1x1280xf32, #tpu.memory_space<vmem>>, %arg2: memref<8x72xf32, #tpu.memory_space<vmem>>, %arg3: memref<8x1xf32, #tpu.memory_space<vmem>>, %arg4: memref<8x1xf32, #tpu.memory_space<vmem>>, %arg5: memref<8x72xf32, #tpu.memory_space<vmem>>, %arg6: memref<8x1xf32, #tpu.memory_space<vmem>>, %arg7: memref<8x1xf32, #tpu.memory_space<vmem>>, %arg8: memref<8x8xf32, #tpu.memory_space<vmem>>, %arg9: memref<8x1xf32, #tpu.memory_space<vmem>>, %arg10: memref<8x1280xf32, #tpu.memory_space<vmem>>, %arg11: memref<72x1280xf32, #tpu.memory_space<vmem>>, %arg12: memref<72x1280xf32, #tpu.memory_space<vmem>>) attributes {dimension_semantics = [], scalar_prefetch = 0 : i64, scratch_operands = 2 : i64, tpu.core_type = #tpu.core_type<tc>} {
    %c0 = arith.constant 0 : index
    %c0_0 = arith.constant 0 : index
    %0 = vector.load %arg0[%c0, %c0_0] : memref<8x1280xf32, #tpu.memory_space<vmem>>, vector<8x1280xf32>
    %c0_1 = arith.constant 0 : index
    %c0_2 = arith.constant 0 : index
    %1 = vector.load %arg1[%c0_1, %c0_2] : memref<1x1280xf32, #tpu.memory_space<vmem>>, vector<1x1280xf32>
    %c2_i32 = arith.constant 2 : i32
    %2 = tpu.dynamic_rotate %0 by %c2_i32 dim 1 : vector<8x1280xf32>, i32 -> vector<8x1280xf32>
    %c0_3 = arith.constant 0 : index
    %c0_4 = arith.constant 0 : index
    %3 = vector.load %arg11[%c0_3, %c0_4] : memref<72x1280xf32, #tpu.memory_space<vmem>>, vector<8x1280xf32>
    tpu.vector_store %arg11[%c0_3, %c0_4], %2 {strides = array<i32>} : memref<72x1280xf32, #tpu.memory_space<vmem>>, vector<8x1280xf32>,
    %c8 = arith.constant 8 : index
    %c0_5 = arith.constant 0 : index
    %4 = vector.load %arg11[%c8, %c0_5] : memref<72x1280xf32, #tpu.memory_space<vmem>>, vector<8x1280xf32>
    tpu.vector_store %arg11[%c8, %c0_5], %0 {strides = array<i32>} : memref<72x1280xf32, #tpu.memory_space<vmem>>, vector<8x1280xf32>,
    %c1278_i32 = arith.constant 1278 : i32
    %5 = tpu.dynamic_rotate %0 by %c1278_i32 dim 1 : vector<8x1280xf32>, i32 -> vector<8x1280xf32>
    %c16 = arith.constant 16 : index
    %c0_6 = arith.constant 0 : index
    %6 = vector.load %arg11[%c16, %c0_6] : memref<72x1280xf32, #tpu.memory_space<vmem>>, vector<8x1280xf32>
    tpu.vector_store %arg11[%c16, %c0_6], %5 {strides = array<i32>} : memref<72x1280xf32, #tpu.memory_space<vmem>>, vector<8x1280xf32>,
    %c1218_i32 = arith.constant 1218 : i32
    %7 = tpu.dynamic_rotate %0 by %c1218_i32 dim 1 : vector<8x1280xf32>, i32 -> vector<8x1280xf32>
    %c24 = arith.constant 24 : index
    %c0_7 = arith.constant 0 : index
    %8 = vector.load %arg11[%c24, %c0_7] : memref<72x1280xf32, #tpu.memory_space<vmem>>, vector<8x1280xf32>
    tpu.vector_store %arg11[%c24, %c0_7], %7 {strides = array<i32>} : memref<72x1280xf32, #tpu.memory_space<vmem>>, vector<8x1280xf32>,
    %c1216_i32 = arith.constant 1216 : i32
    %9 = tpu.dynamic_rotate %0 by %c1216_i32 dim 1 : vector<8x1280xf32>, i32 -> vector<8x1280xf32>
    %c32 = arith.constant 32 : index
    %c0_8 = arith.constant 0 : index
    %10 = vector.load %arg11[%c32, %c0_8] : memref<72x1280xf32, #tpu.memory_space<vmem>>, vector<8x1280xf32>
    tpu.vector_store %arg11[%c32, %c0_8], %9 {strides = array<i32>} : memref<72x1280xf32, #tpu.memory_space<vmem>>, vector<8x1280xf32>,
    %c1214_i32 = arith.constant 1214 : i32
    %11 = tpu.dynamic_rotate %0 by %c1214_i32 dim 1 : vector<8x1280xf32>, i32 -> vector<8x1280xf32>
    %c40 = arith.constant 40 : index
    %c0_9 = arith.constant 0 : index
    %12 = vector.load %arg11[%c40, %c0_9] : memref<72x1280xf32, #tpu.memory_space<vmem>>, vector<8x1280xf32>
    tpu.vector_store %arg11[%c40, %c0_9], %11 {strides = array<i32>} : memref<72x1280xf32, #tpu.memory_space<vmem>>, vector<8x1280xf32>,
    %c1154_i32 = arith.constant 1154 : i32
    %13 = tpu.dynamic_rotate %0 by %c1154_i32 dim 1 : vector<8x1280xf32>, i32 -> vector<8x1280xf32>
    %c48 = arith.constant 48 : index
    %c0_10 = arith.constant 0 : index
    %14 = vector.load %arg11[%c48, %c0_10] : memref<72x1280xf32, #tpu.memory_space<vmem>>, vector<8x1280xf32>
    tpu.vector_store %arg11[%c48, %c0_10], %13 {strides = array<i32>} : memref<72x1280xf32, #tpu.memory_space<vmem>>, vector<8x1280xf32>,
    %c1152_i32 = arith.constant 1152 : i32
    %15 = tpu.dynamic_rotate %0 by %c1152_i32 dim 1 : vector<8x1280xf32>, i32 -> vector<8x1280xf32>
    %c56 = arith.constant 56 : index
    %c0_11 = arith.constant 0 : index
    %16 = vector.load %arg11[%c56, %c0_11] : memref<72x1280xf32, #tpu.memory_space<vmem>>, vector<8x1280xf32>
    tpu.vector_store %arg11[%c56, %c0_11], %15 {strides = array<i32>} : memref<72x1280xf32, #tpu.memory_space<vmem>>, vector<8x1280xf32>,
    %c1150_i32 = arith.constant 1150 : i32
    %17 = tpu.dynamic_rotate %0 by %c1150_i32 dim 1 : vector<8x1280xf32>, i32 -> vector<8x1280xf32>
    %c64 = arith.constant 64 : index
    %c0_12 = arith.constant 0 : index
    %18 = vector.load %arg11[%c64, %c0_12] : memref<72x1280xf32, #tpu.memory_space<vmem>>, vector<8x1280xf32>
    tpu.vector_store %arg11[%c64, %c0_12], %17 {strides = array<i32>} : memref<72x1280xf32, #tpu.memory_space<vmem>>, vector<8x1280xf32>,
    %c0_13 = arith.constant 0 : index
    %c0_14 = arith.constant 0 : index
    %19 = vector.load %arg2[%c0_13, %c0_14] : memref<8x72xf32, #tpu.memory_space<vmem>>, vector<8x72xf32>
    %c0_15 = arith.constant 0 : index
    %c0_16 = arith.constant 0 : index
    %20 = vector.load %arg11[%c0_15, %c0_16] : memref<72x1280xf32, #tpu.memory_space<vmem>>, vector<72x1280xf32>
    %cst = arith.constant dense<0.000000e+00> : vector<8x1280xf32>
    %21 = tpu.matmul %19, %20, %cst {dimension_numbers = #tpu.dot_dimension_numbers<[1], [0], [0], [1], [0, 0, 1, 1], [], []>} : vector<8x72xf32>, vector<72x1280xf32>, vector<8x1280xf32> -> vector<8x1280xf32>
    %22 = vector.broadcast %1 : vector<1x1280xf32> to vector<8x1280xf32>
    %23 = arith.mulf %21, %22 : vector<8x1280xf32>
    %cst_17 = arith.constant dense<0.000000e+00> : vector<8xf32>
    %24 = vector.multi_reduction <add>, %23, %cst_17 [1] : vector<8x1280xf32> to vector<8xf32>
    %25 = vector.shape_cast %24 : vector<8xf32> to vector<8x1xf32>
    %cst_18 = arith.constant 0.001953125 : f32
    %26 = vector.broadcast %cst_18 : f32 to vector<8x1xf32>
    %27 = arith.mulf %25, %26 : vector<8x1xf32>
    %28 = vector.broadcast %27 : vector<8x1xf32> to vector<8x1280xf32>
    %29 = arith.subf %21, %28 : vector<8x1280xf32>
    %30 = arith.mulf %29, %29 : vector<8x1280xf32>
    %31 = vector.broadcast %1 : vector<1x1280xf32> to vector<8x1280xf32>
    %32 = arith.mulf %30, %31 : vector<8x1280xf32>
    %cst_19 = arith.constant dense<0.000000e+00> : vector<8xf32>
    %33 = vector.multi_reduction <add>, %32, %cst_19 [1] : vector<8x1280xf32> to vector<8xf32>
    %34 = vector.shape_cast %33 : vector<8xf32> to vector<8x1xf32>
    %cst_20 = arith.constant 0.001953125 : f32
    %35 = vector.broadcast %cst_20 : f32 to vector<8x1xf32>
    %36 = arith.mulf %34, %35 : vector<8x1xf32>
    %cst_21 = arith.constant 9.99999974E-6 : f32
    %37 = vector.broadcast %cst_21 : f32 to vector<8x1xf32>
    %38 = arith.addf %36, %37 : vector<8x1xf32>
    %39 = math.rsqrt %38 : vector<8x1xf32>
    %c0_22 = arith.constant 0 : index
    %c0_23 = arith.constant 0 : index
    %40 = vector.load %arg3[%c0_22, %c0_23] : memref<8x1xf32, #tpu.memory_space<vmem>>, vector<8x1xf32>
    %41 = arith.mulf %39, %40 : vector<8x1xf32>
    %42 = vector.broadcast %41 : vector<8x1xf32> to vector<8x1280xf32>
    %43 = arith.mulf %29, %42 : vector<8x1280xf32>
    %c0_24 = arith.constant 0 : index
    %c0_25 = arith.constant 0 : index
    %44 = vector.load %arg4[%c0_24, %c0_25] : memref<8x1xf32, #tpu.memory_space<vmem>>, vector<8x1xf32>
    %45 = vector.broadcast %44 : vector<8x1xf32> to vector<8x1280xf32>
    %46 = arith.addf %43, %45 : vector<8x1280xf32>
    %cst_26 = arith.constant 0.000000e+00 : f32
    %47 = vector.broadcast %cst_26 : f32 to vector<8x1280xf32>
    %48 = arith.maximumf %46, %47 : vector<8x1280xf32>
    %49 = vector.broadcast %1 : vector<1x1280xf32> to vector<8x1280xf32>
    %50 = arith.mulf %48, %49 : vector<8x1280xf32>
    %c66_i32 = arith.constant 66 : i32
    %51 = tpu.dynamic_rotate %50 by %c66_i32 dim 1 : vector<8x1280xf32>, i32 -> vector<8x1280xf32>
    %c0_27 = arith.constant 0 : index
    %c0_28 = arith.constant 0 : index
    %52 = vector.load %arg12[%c0_27, %c0_28] : memref<72x1280xf32, #tpu.memory_space<vmem>>, vector<8x1280xf32>
    tpu.vector_store %arg12[%c0_27, %c0_28], %51 {strides = array<i32>} : memref<72x1280xf32, #tpu.memory_space<vmem>>, vector<8x1280xf32>,
    %c64_i32 = arith.constant 64 : i32
    %53 = tpu.dynamic_rotate %50 by %c64_i32 dim 1 : vector<8x1280xf32>, i32 -> vector<8x1280xf32>
    %c8_29 = arith.constant 8 : index
    %c0_30 = arith.constant 0 : index
    %54 = vector.load %arg12[%c8_29, %c0_30] : memref<72x1280xf32, #tpu.memory_space<vmem>>, vector<8x1280xf32>
    tpu.vector_store %arg12[%c8_29, %c0_30], %53 {strides = array<i32>} : memref<72x1280xf32, #tpu.memory_space<vmem>>, vector<8x1280xf32>,
    %c62_i32 = arith.constant 62 : i32
    %55 = tpu.dynamic_rotate %50 by %c62_i32 dim 1 : vector<8x1280xf32>, i32 -> vector<8x1280xf32>
    %c16_31 = arith.constant 16 : index
    %c0_32 = arith.constant 0 : index
    %56 = vector.load %arg12[%c16_31, %c0_32] : memref<72x1280xf32, #tpu.memory_space<vmem>>, vector<8x1280xf32>
    tpu.vector_store %arg12[%c16_31, %c0_32], %55 {strides = array<i32>} : memref<72x1280xf32, #tpu.memory_space<vmem>>, vector<8x1280xf32>,
    %c2_i32_33 = arith.constant 2 : i32
    %57 = tpu.dynamic_rotate %50 by %c2_i32_33 dim 1 : vector<8x1280xf32>, i32 -> vector<8x1280xf32>
    %c24_34 = arith.constant 24 : index
    %c0_35 = arith.constant 0 : index
    %58 = vector.load %arg12[%c24_34, %c0_35] : memref<72x1280xf32, #tpu.memory_space<vmem>>, vector<8x1280xf32>
    tpu.vector_store %arg12[%c24_34, %c0_35], %57 {strides = array<i32>} : memref<72x1280xf32, #tpu.memory_space<vmem>>, vector<8x1280xf32>,
    %c32_36 = arith.constant 32 : index
    %c0_37 = arith.constant 0 : index
    %59 = vector.load %arg12[%c32_36, %c0_37] : memref<72x1280xf32, #tpu.memory_space<vmem>>, vector<8x1280xf32>
    tpu.vector_store %arg12[%c32_36, %c0_37], %50 {strides = array<i32>} : memref<72x1280xf32, #tpu.memory_space<vmem>>, vector<8x1280xf32>,
    %c1278_i32_38 = arith.constant 1278 : i32
    %60 = tpu.dynamic_rotate %50 by %c1278_i32_38 dim 1 : vector<8x1280xf32>, i32 -> vector<8x1280xf32>
    %c40_39 = arith.constant 40 : index
    %c0_40 = arith.constant 0 : index
    %61 = vector.load %arg12[%c40_39, %c0_40] : memref<72x1280xf32, #tpu.memory_space<vmem>>, vector<8x1280xf32>
    tpu.vector_store %arg12[%c40_39, %c0_40], %60 {strides = array<i32>} : memref<72x1280xf32, #tpu.memory_space<vmem>>, vector<8x1280xf32>,
    %c1218_i32_41 = arith.constant 1218 : i32
    %62 = tpu.dynamic_rotate %50 by %c1218_i32_41 dim 1 : vector<8x1280xf32>, i32 -> vector<8x1280xf32>
    %c48_42 = arith.constant 48 : index
    %c0_43 = arith.constant 0 : index
    %63 = vector.load %arg12[%c48_42, %c0_43] : memref<72x1280xf32, #tpu.memory_space<vmem>>, vector<8x1280xf32>
    tpu.vector_store %arg12[%c48_42, %c0_43], %62 {strides = array<i32>} : memref<72x1280xf32, #tpu.memory_space<vmem>>, vector<8x1280xf32>,
    %c1216_i32_44 = arith.constant 1216 : i32
    %64 = tpu.dynamic_rotate %50 by %c1216_i32_44 dim 1 : vector<8x1280xf32>, i32 -> vector<8x1280xf32>
    %c56_45 = arith.constant 56 : index
    %c0_46 = arith.constant 0 : index
    %65 = vector.load %arg12[%c56_45, %c0_46] : memref<72x1280xf32, #tpu.memory_space<vmem>>, vector<8x1280xf32>
    tpu.vector_store %arg12[%c56_45, %c0_46], %64 {strides = array<i32>} : memref<72x1280xf32, #tpu.memory_space<vmem>>, vector<8x1280xf32>,
    %c1214_i32_47 = arith.constant 1214 : i32
    %66 = tpu.dynamic_rotate %50 by %c1214_i32_47 dim 1 : vector<8x1280xf32>, i32 -> vector<8x1280xf32>
    %c64_48 = arith.constant 64 : index
    %c0_49 = arith.constant 0 : index
    %67 = vector.load %arg12[%c64_48, %c0_49] : memref<72x1280xf32, #tpu.memory_space<vmem>>, vector<8x1280xf32>
    tpu.vector_store %arg12[%c64_48, %c0_49], %66 {strides = array<i32>} : memref<72x1280xf32, #tpu.memory_space<vmem>>, vector<8x1280xf32>,
    %c0_50 = arith.constant 0 : index
    %c0_51 = arith.constant 0 : index
    %68 = vector.load %arg5[%c0_50, %c0_51] : memref<8x72xf32, #tpu.memory_space<vmem>>, vector<8x72xf32>
    %c0_52 = arith.constant 0 : index
    %c0_53 = arith.constant 0 : index
    %69 = vector.load %arg12[%c0_52, %c0_53] : memref<72x1280xf32, #tpu.memory_space<vmem>>, vector<72x1280xf32>
    %cst_54 = arith.constant dense<0.000000e+00> : vector<8x1280xf32>
    %70 = tpu.matmul %68, %69, %cst_54 {dimension_numbers = #tpu.dot_dimension_numbers<[1], [0], [0], [1], [0, 0, 1, 1], [], []>} : vector<8x72xf32>, vector<72x1280xf32>, vector<8x1280xf32> -> vector<8x1280xf32>
    %71 = vector.broadcast %1 : vector<1x1280xf32> to vector<8x1280xf32>
    %72 = arith.mulf %70, %71 : vector<8x1280xf32>
    %cst_55 = arith.constant dense<0.000000e+00> : vector<8xf32>
    %73 = vector.multi_reduction <add>, %72, %cst_55 [1] : vector<8x1280xf32> to vector<8xf32>
    %74 = vector.shape_cast %73 : vector<8xf32> to vector<8x1xf32>
    %cst_56 = arith.constant 0.001953125 : f32
    %75 = vector.broadcast %cst_56 : f32 to vector<8x1xf32>
    %76 = arith.mulf %74, %75 : vector<8x1xf32>
    %77 = vector.broadcast %76 : vector<8x1xf32> to vector<8x1280xf32>
    %78 = arith.subf %70, %77 : vector<8x1280xf32>
    %79 = arith.mulf %78, %78 : vector<8x1280xf32>
    %80 = vector.broadcast %1 : vector<1x1280xf32> to vector<8x1280xf32>
    %81 = arith.mulf %79, %80 : vector<8x1280xf32>
    %cst_57 = arith.constant dense<0.000000e+00> : vector<8xf32>
    %82 = vector.multi_reduction <add>, %81, %cst_57 [1] : vector<8x1280xf32> to vector<8xf32>
    %83 = vector.shape_cast %82 : vector<8xf32> to vector<8x1xf32>
    %cst_58 = arith.constant 0.001953125 : f32
    %84 = vector.broadcast %cst_58 : f32 to vector<8x1xf32>
    %85 = arith.mulf %83, %84 : vector<8x1xf32>
    %cst_59 = arith.constant 9.99999974E-6 : f32
    %86 = vector.broadcast %cst_59 : f32 to vector<8x1xf32>
    %87 = arith.addf %85, %86 : vector<8x1xf32>
    %88 = math.rsqrt %87 : vector<8x1xf32>
    %c0_60 = arith.constant 0 : index
    %c0_61 = arith.constant 0 : index
    %89 = vector.load %arg6[%c0_60, %c0_61] : memref<8x1xf32, #tpu.memory_space<vmem>>, vector<8x1xf32>
    %90 = arith.mulf %88, %89 : vector<8x1xf32>
    %91 = vector.broadcast %90 : vector<8x1xf32> to vector<8x1280xf32>
    %92 = arith.mulf %78, %91 : vector<8x1280xf32>
    %c0_62 = arith.constant 0 : index
    %c0_63 = arith.constant 0 : index
    %93 = vector.load %arg7[%c0_62, %c0_63] : memref<8x1xf32, #tpu.memory_space<vmem>>, vector<8x1xf32>
    %94 = vector.broadcast %93 : vector<8x1xf32> to vector<8x1280xf32>
    %95 = arith.addf %92, %94 : vector<8x1280xf32>
    %c32_64 = arith.constant 32 : index
    %c0_65 = arith.constant 0 : index
    %96 = vector.load %arg11[%c32_64, %c0_65] : memref<72x1280xf32, #tpu.memory_space<vmem>>, vector<8x1280xf32>
    %c0_66 = arith.constant 0 : index
    %c0_67 = arith.constant 0 : index
    %97 = vector.load %arg8[%c0_66, %c0_67] : memref<8x8xf32, #tpu.memory_space<vmem>>, vector<8x8xf32>
    %cst_68 = arith.constant dense<0.000000e+00> : vector<8x1280xf32>
    %98 = tpu.matmul %97, %96, %cst_68 {dimension_numbers = #tpu.dot_dimension_numbers<[1], [0], [0], [1], [0, 0, 1, 1], [], []>} : vector<8x8xf32>, vector<8x1280xf32>, vector<8x1280xf32> -> vector<8x1280xf32>
    %c0_69 = arith.constant 0 : index
    %c0_70 = arith.constant 0 : index
    %99 = vector.load %arg9[%c0_69, %c0_70] : memref<8x1xf32, #tpu.memory_space<vmem>>, vector<8x1xf32>
    %100 = vector.broadcast %99 : vector<8x1xf32> to vector<8x1280xf32>
    %101 = arith.addf %98, %100 : vector<8x1280xf32>
    %102 = arith.addf %95, %101 : vector<8x1280xf32>
    %cst_71 = arith.constant 0.000000e+00 : f32
    %103 = vector.broadcast %cst_71 : f32 to vector<8x1280xf32>
    %104 = arith.maximumf %102, %103 : vector<8x1280xf32>
    %c0_72 = arith.constant 0 : index
    %c0_73 = arith.constant 0 : index
    %105 = vector.load %arg10[%c0_72, %c0_73] : memref<8x1280xf32, #tpu.memory_space<vmem>>, vector<8x1280xf32>
    tpu.vector_store %arg10[%c0_72, %c0_73], %104 {strides = array<i32>} : memref<8x1280xf32, #tpu.memory_space<vmem>>, vector<8x1280xf32>,
    return
  }
}

</mosaic_0001>

<bundles_post_ra>
// kernel: dilated_residual_block.1
= control target key start
LH: loop header
LB: loop body
LE: loop exit
PB: predicated region body
PF: predicated region fallthrough
CT: control target
= control target key end

     0   :  { %s2456_s19 = smov 126   ;;  %s2457_s22 = smov 2   ;;  %v3418_v13 = vmov 0.0   ;;  %v67_v19 = vlaneseq  ;;  %vm385_vm5 = vcmask 588800   ;;  %vm1720_vm6 = vcmask 64512   ;;  %s3404_s0 = inlined_call_operand.vmem [shape: f32[8,1280], index: 0, kind: input, shape index: {}]   ;;  %s3405_s2 = inlined_call_operand.vmem [shape: f32[8,72], index: 2, kind: input, shape index: {}]   ;;  %s3406_s1 = inlined_call_operand.vmem [shape: f32[1,1280], index: 1, kind: input, shape index: {}]   ;;  %s3407_s4 = inlined_call_operand.vmem [shape: f32[8,1], index: 4, kind: input, shape index: {}]   ;;  %s3408_s3 = inlined_call_operand.vmem [shape: f32[8,1], index: 3, kind: input, shape index: {}]   ;;  %s3409_s5 = inlined_call_operand.vmem [shape: f32[8,72], index: 5, kind: input, shape index: {}]   ;;  %s3410_s8 = inlined_call_operand.vmem [shape: f32[8,8], index: 8, kind: input, shape index: {}]   ;;  %s3411_s7 = inlined_call_operand.vmem [shape: f32[8,1], index: 7, kind: input, shape index: {}]   ;;  %s3412_s9 = inlined_call_operand.vmem [shape: f32[8,1], index: 9, kind: input, shape index: {}]   ;;  %s3413_s6 = inlined_call_operand.vmem [shape: f32[8,1], index: 6, kind: input, shape index: {}]   ;;  %s3414_s10 = inlined_call_operand.vmem [shape: f32[8,1280], index: 10, kind: output, shape index: {}]  }
   0x1   :  { %v2521_v0 = vld [vmem:[%s3404_s0 + $0x8] sm:$0xff]  ;;  %v2526_v1 = vld [vmem:[%s3404_s0] sm:$0xff]  ;;  %v2531_v2 = vld [vmem:[%s3404_s0 + $0x10] sm:$0xff]  ;;  %s2458_s25 = smov 66   ;;  %s2459_s26 = smov 64   ;;  %453 = vmatprep.mubr.f32.mxu0 %v3418_v13  ;;  %524 = vmatprep.mubr.f32.mxu1 %v3418_v13 }
   0x2   :  { %102 = vrot.lane.b32.xlu1 %v2521_v0, %s2456_s19  ;;  %v2295_v3 = vpack.i.bf16 %v2521_v0, %v2526_v1  ;;  %v2540_v4 = vld [vmem:[%s3404_s0 + $0x48] sm:$0xff]  ;;  %v2305_v6 = vpack.i.bf16 %v2531_v2, %v2521_v0  ;;  %v2553_v7 = vld [vmem:[%s3404_s0 + $0x18] sm:$0xff]  ;;  %s2460_s27 = smov 62   ;;  %v2572_v10 = vld [vmem:[%s3404_s0 + $0x30] sm:$0xff]  ;;  %v2648_v20 = vand.u32 127, %v67_v19 }
   0x3   :  { %v2300_v5 = vpack.i.bf16 %v2531_v2, %v2540_v4  ;;  %v2310_v8 = vpack.i.bf16 %v2553_v7, %v2526_v1  ;;  %v2567_v9 = vld [vmem:[%s3404_s0 + $0x28] sm:$0xff]  ;;  %v2579_v11 = vld [vmem:[%s3404_s0 + $0x20] sm:$0xff]  ;;  %v2615_v16 = vld [vmem:[%s3404_s0 + $0x38] sm:$0xff] }
   0x4   :  { %2296 = vrot.lane.b32.xlu0 %v2295_v3, %s2457_s22  ;;  %v2330_v12 = vpack.i.bf16 %v2572_v10, %v2567_v9  ;;  %v2325_v14 = vpack.i.bf16 %v2579_v11, %v2553_v7  ;;  %v2335_v15 = vpack.i.bf16 %v2567_v9, %v2579_v11  ;;  %v2620_v17 = vld [vmem:[%s3404_s0 + $0x40] sm:$0xff]  ;;  %vm69_vm0 = vcmp.lt.s32.totalorder %v2648_v20, 2 }
   0x5   :  { %v2345_v18 = vpack.i.bf16 %v2620_v17, %v2615_v16  ;;  %vm120_vm1 = vcmp.lt.s32.totalorder %v2648_v20, 126  ;;  %vm161_vm2 = vcmp.lt.s32.totalorder %v2648_v20, 66  ;;  %vm202_vm3 = vcmp.lt.s32.totalorder %v2648_v20, 64 }
   0x6   :  { %104 = vrot.lane.b32.xlu1 %v2531_v2, %s2456_s19  ;;  %vm243_vm4 = vcmp.lt.s32.totalorder %v2648_v20, 62  ;;  %v1713_v20 = vld [vmem:[%s3410_s8] sm:$0xff] }
   0x8   :  { %2301 = vrot.lane.b32.xlu0 %v2300_v5, %s2457_s22 }
   0xa   :  { %100 = vrot.lane.b32.xlu1 %v2526_v1, %s2456_s19 }
   0xc   :  { %2306 = vrot.lane.b32.xlu0 %v2305_v6, %s2458_s25 }
   0xe   :  { %184 = vrot.lane.b32.xlu1 %v2521_v0, %s2459_s26 }
  0x10   :  { %2311 = vrot.lane.b32.xlu0 %v2310_v8, %s2458_s25 }
  0x12   :  { %2316 = vrot.lane.b32.xlu1 %v2305_v6, %s2460_s27 }
  0x14   :  { %186 = vrot.lane.b32.xlu0 %v2531_v2, %s2459_s26 }
  0x16   :  { %2321 = vrot.lane.b32.xlu1 %v2310_v8, %s2460_s27 }
  0x18   :  { %182 = vrot.lane.b32.xlu0 %v2526_v1, %s2459_s26 }
  0x1a   :  { %2331 = vrot.lane.b32.xlu1 %v2330_v12, %s2457_s22 }
  0x1c   :  { %2326 = vrot.lane.b32.xlu0 %v2325_v14, %s2457_s22 }
  0x1e   :  { %108 = vrot.lane.b32.xlu1 %v2579_v11, %s2456_s19 }
  0x20   :  { %106 = vrot.lane.b32.xlu0 %v2553_v7, %s2456_s19 }
  0x22   :  { %110 = vrot.lane.b32.xlu1 %v2567_v9, %s2456_s19 }
  0x24   :  { %2336 = vrot.lane.b32.xlu0 %v2335_v15, %s2458_s25 }
  0x26   :  { %153 = vrot.lane.b32.xlu1 %v2572_v10, %s2458_s25 }
  0x28   :  { %112 = vrot.lane.b32.xlu0 %v2572_v10, %s2456_s19 }
  0x2a   :  { %190 = vrot.lane.b32.xlu1 %v2579_v11, %s2459_s26 }
  0x2c   :  { %188 = vrot.lane.b32.xlu0 %v2553_v7, %s2459_s26 }
  0x2e   :  { %192 = vrot.lane.b32.xlu1 %v2567_v9, %s2459_s26 }
  0x30   :  { %2341 = vrot.lane.b32.xlu0 %v2335_v15, %s2460_s27 }
  0x32   :  { %235 = vrot.lane.b32.xlu1 %v2572_v10, %s2460_s27 }
  0x34   :  { %194 = vrot.lane.b32.xlu0 %v2572_v10, %s2459_s26 }
  0x36   :  { %114 = vrot.lane.b32.xlu1 %v2615_v16, %s2456_s19 }
  0x38   :  { %2346 = vrot.lane.b32.xlu0 %v2345_v18, %s2457_s22 }
  0x3a   :  { %2351 = vrot.lane.b32.xlu1 %v2345_v18, %s2458_s25 }
  0x3c   :  { %116 = vrot.lane.b32.xlu0 %v2620_v17, %s2456_s19 }
  0x3e   :  { %159 = vrot.lane.b32.xlu1 %v2540_v4, %s2458_s25 }
  0x40   :  { %118 = vrot.lane.b32.xlu0 %v2540_v4, %s2456_s19 }
  0x42   :  { %198 = vrot.lane.b32.xlu1 %v2620_v17, %s2459_s26 }
  0x44   :  { %196 = vrot.lane.b32.xlu0 %v2615_v16, %s2459_s26 }
  0x46   :  { %200 = vrot.lane.b32.xlu1 %v2540_v4, %s2459_s26 }
  0x48   :  { %2356 = vrot.lane.b32.xlu0 %v2345_v18, %s2460_s27 }
  0x4c   :  { %241 = vrot.lane.b32.xlu0 %v2540_v4, %s2460_s27 }
  0x74   :  { %v103_v21 = vpop.permute.xlu1 %102 }
  0x76   :  { %v2297_v22 = vpop.permute.xlu0 %2296 }
  0x77   :  { %v2299_v23 = vunpack.i.h.bf16 %v2297_v22  ;;  %v2298_v24 = vunpack.i.l.bf16 %v2297_v22 }
  0x78   :  { %v105_v25 = vpop.permute.xlu1 %104 }
  0x79   :  { %v78_v26 = vsel %vm69_vm0, %v2298_v24, %v2299_v23  ;;  %v128_v37 = vsel %vm120_vm1, %v103_v21, %v105_v25 }
  0x7a   :  { %v2653_v27 = vpop.permute.xlu0 %2301  ;;  %v2128_v28 = vpack.c.bf16 %v2521_v0, %v78_v26 }
  0x7b   :  { %v2303_v29 = vunpack.i.l.bf16 %v2653_v27  ;;  %v2304_v47 = vunpack.i.h.bf16 %v2653_v27 }
  0x7c   :  { %v2657_v30 = vpop.permute.xlu1 %100  ;;  %2129 = vmatprep.subr.bf16.mxu0 %v2128_v28 }
  0x7d   :  { %v79_v31 = vsel %vm69_vm0, %v2303_v29, %v2298_v24  ;;  %v2689_v43 = vsel %vm120_vm1, %v2657_v30, %v103_v21  ;;  %v77_v56 = vsel %vm69_vm0, %v2299_v23, %v2304_v47 }
  0x7e   :  { %v2664_v32 = vpop.permute.xlu0 %2306  ;;  %v2667_v33 = vpack.c.bf16 %v2526_v1, %v79_v31  ;;  %v2140_v61 = vpack.c.bf16 %v2531_v2, %v77_v56 }
  0x7f   :  { %v2309_v34 = vunpack.i.h.bf16 %v2664_v32  ;;  %v2308_v35 = vunpack.i.l.bf16 %v2664_v32 }
  0x80   :  { %v185_v36 = vpop.permute.xlu1 %184  ;;  %2131 = vmatpush1.bf16.msra.mxu0 %v2667_v33 }
  0x81   :  { %v169_v38 = vsel %vm161_vm2, %v2308_v35, %v2309_v34 }
  0x82   :  { %v2679_v39 = vpop.permute.xlu0 %2311  ;;  %v2132_v40 = vpack.c.bf16 %v169_v38, %v128_v37 }
  0x83   :  { %v2313_v41 = vunpack.i.l.bf16 %v2679_v39  ;;  %v2314_v21 = vunpack.i.h.bf16 %v2679_v39 }
  0x84   :  { %v2682_v42 = vpop.permute.xlu1 %2316  ;;  %2133 = vmatprep.subr.bf16.mxu0 %v2132_v40 }
  0x85   :  { %v2319_v44 = vunpack.i.h.bf16 %v2682_v42  ;;  %v2318_v45 = vunpack.i.l.bf16 %v2682_v42  ;;  %v170_v46 = vsel %vm161_vm2, %v2313_v41, %v2308_v35  ;;  %v168_v31 = vsel %vm161_vm2, %v2309_v34, %v2314_v21 }
  0x86   :  { %v2698_v48 = vpop.permute.xlu0 %186  ;;  %v2134_v49 = vpack.c.bf16 %v170_v46, %v2689_v43 }
  0x87   :  { %v251_v50 = vsel %vm243_vm4, %v2318_v45, %v2319_v44  ;;  %v2708_v51 = vsel %vm202_vm3, %v185_v36, %v2698_v48 }
  0x88   :  { %v2136_v52 = vpack.c.bf16 %v251_v50, %v2708_v51  ;;  %v2711_v53 = vpop.permute.xlu1 %2321  ;;  %2135 = vmatpush1.bf16.msra.mxu0 %v2134_v49 }
  0x89   :  { %v2323_v54 = vunpack.i.l.bf16 %v2711_v53  ;;  %v2324_v50 = vunpack.i.h.bf16 %v2711_v53  ;;  %v747_v53 = vshrl.u32 %v67_v19, 7 }
  0x8a   :  { %v2714_v55 = vpop.permute.xlu0 %182  ;;  %2137 = vmatprep.subr.bf16.mxu0 %v2136_v52 }
  0x8b   :  { %v252_v57 = vsel %vm243_vm4, %v2323_v54, %v2318_v45  ;;  %v2725_v58 = vsel %vm202_vm3, %v2714_v55, %v185_v36  ;;  %v764_v19 = vsub.s32 4, %v747_v53 }
  0x8c   :  { %v2138_v59 = vpack.c.bf16 %v252_v57, %v2725_v58  ;;  %v2728_v60 = vpop.permute.xlu1 %2331 }
  0x8d   :  { %v2333_v62 = vunpack.i.l.bf16 %v2728_v60  ;;  %v2334_v56 = vunpack.i.h.bf16 %v2728_v60 }
  0x8e   :  { %v2327_v63 = vpop.permute.xlu0 %2326  ;;  %2139 = vmatpush1.bf16.msra.mxu0 %v2138_v59 }
  0x8f   :  { %v2329_v0 = vunpack.i.h.bf16 %v2327_v63  ;;  %v2328_v1 = vunpack.i.l.bf16 %v2327_v63  ;;  %2141 = vmatprep.subr.bf16.mxu0 %v2140_v61 }
  0x90   :  { %v109_v3 = vpop.permute.xlu1 %108 }
  0x91   :  { %v76_v5 = vsel %vm69_vm0, %v2304_v47, %v2328_v1  ;;  %v74_v2 = vsel %vm69_vm0, %v2329_v0, %v2333_v62  ;;  %v75_v12 = vsel %vm69_vm0, %v2328_v1, %v2329_v0 }
  0x92   :  { %v107_v6 = vpop.permute.xlu0 %106  ;;  %2143 = vmatpush1.bf16.msra.mxu0 %v2128_v28  ;;  %v2735_v8 = vpack.c.bf16 %v2553_v7, %v76_v5  ;;  %v2749_v7 = vld [vmem:[%s3405_s2] sm:$0xff]  ;;  %v2752_v18 = vpack.c.bf16 %v2567_v9, %v74_v2  ;;  %v2156_v22 = vpack.c.bf16 %v2579_v11, %v75_v12 }
  0x93   :  { %v127_v14 = vsel %vm120_vm1, %v105_v25, %v107_v6  ;;  %v2764_v9 = vsel %vm120_vm1, %v107_v6, %v109_v3 }
  0x94   :  { %v111_v15 = vpop.permute.xlu1 %110  ;;  %405 = vmatprep.subr.mxu0 %v127_v14  ;;  %2145 = vmatprep.subr.bf16.mxu1 %v2735_v8  ;;  %v2150_v38 = vpack.c.bf16 %v168_v31, %v127_v14  ;;  %v73_v14 = vsel %vm69_vm0, %v2333_v62, %v2334_v56 }
  0x95   :  { %2147 = vmatpush1.bf16.msra.mxu1 %v2140_v61  ;;  %v125_v28 = vsel %vm120_vm1, %v109_v3, %v111_v15  ;;  %v250_v3 = vsel %vm243_vm4, %v2319_v44, %v2324_v50 }
  0x96   :  { %v2337_v23 = vpop.permute.xlu0 %2336  ;;  %406 = vmatpush1.msra.mxu0 %v128_v37 }
  0x97   :  { %v2339_v24 = vunpack.i.h.bf16 %v2337_v23  ;;  %v2338_v25 = vunpack.i.l.bf16 %v2337_v23  ;;  %2161 = vmatprep.subr.bf16.mxu0 %v2752_v18  ;;  %2113 = vmatmul.mubr.msk.f32.vlgmr.msra.gmra.mrb[0].mxu0 %vm385_vm5, %v2749_v7 }
  0x98   :  { %v2759_v26 = vpop.permute.xlu1 %153  ;;  %2163 = vmatpush1.bf16.msra.mxu0 %v2156_v22  ;;  %595 = vmatprep.mubr.f32.mxu0 %v3418_v13 }
  0x99   :  { %v167_v11 = vsel %vm161_vm2, %v2314_v21, %v2338_v25  ;;  %v166_v35 = vsel %vm161_vm2, %v2338_v25, %v2339_v24  ;;  %v165_v40 = vsel %vm161_vm2, %v2339_v24, %v2759_v26  ;;  %v2172_v25 = vpack.c.bf16 %v2572_v10, %v73_v14 }
  0x9a   :  { %v113_v36 = vpop.permute.xlu0 %112  ;;  %v2148_v37 = vpack.c.bf16 %v167_v11, %v2764_v9  ;;  %v2166_v34 = vpack.c.bf16 %v166_v35, %v125_v28 }
  0x9b   :  { %v2782_v45 = vsel %vm120_vm1, %v111_v15, %v113_v36 }
  0x9c   :  { %v2164_v32 = vpack.c.bf16 %v165_v40, %v2782_v45  ;;  %v191_v46 = vpop.permute.xlu1 %190  ;;  %2149 = vmatprep.subr.bf16.mxu1 %v2148_v37 }
  0x9d   :  { %2151 = vmatpush1.bf16.msra.mxu1 %v2150_v38 }
  0x9e   :  { %v189_v47 = vpop.permute.xlu0 %188  ;;  %2165 = vmatprep.subr.bf16.mxu0 %v2164_v32 }
  0x9f   :  { %2167 = vmatpush1.bf16.msra.mxu0 %v2166_v34  ;;  %v2790_v61 = vsel %vm202_vm3, %v2698_v48, %v189_v47  ;;  %v2796_v0 = vsel %vm202_vm3, %v189_v47, %v191_v46 }
  0xa0   :  { %v193_v49 = vpop.permute.xlu1 %192  ;;  %v2154_v12 = vpack.c.bf16 %v250_v3, %v2790_v61 }
  0xa1   :  { %v2806_v5 = vsel %vm202_vm3, %v191_v46, %v193_v49 }
  0xa2   :  { %v2342_v52 = vpop.permute.xlu0 %2341 }
  0xa3   :  { %v2344_v57 = vunpack.i.h.bf16 %v2342_v52  ;;  %v2343_v59 = vunpack.i.l.bf16 %v2342_v52 }
  0xa4   :  { %v2792_v63 = vpop.permute.xlu1 %235 }
  0xa5   :  { %v249_v1 = vsel %vm243_vm4, %v2324_v50, %v2343_v59  ;;  %v248_v48 = vsel %vm243_vm4, %v2343_v59, %v2344_v57  ;;  %v247_v42 = vsel %vm243_vm4, %v2344_v57, %v2792_v63 }
  0xa6   :  { %v2810_v6 = vpop.permute.xlu0 %194  ;;  %v2152_v2 = vpack.c.bf16 %v249_v1, %v2796_v0  ;;  %v2170_v23 = vpack.c.bf16 %v248_v48, %v2806_v5 }
  0xa7   :  { %v2820_v44 = vsel %vm202_vm3, %v193_v49, %v2810_v6 }
  0xa8   :  { %v2168_v15 = vpack.c.bf16 %v247_v42, %v2820_v44  ;;  %v115_v21 = vpop.permute.xlu1 %114  ;;  %2153 = vmatprep.subr.bf16.mxu1 %v2152_v2 }
  0xa9   :  { %2155 = vmatpush1.bf16.msra.mxu1 %v2154_v12  ;;  %v123_v40 = vsel %vm120_vm1, %v113_v36, %v115_v21 }
  0xaa   :  { %v2347_v24 = vpop.permute.xlu0 %2346  ;;  %2157 = vmatprep.subr.bf16.mxu1 %v2156_v22  ;;  %2169 = vmatprep.subr.bf16.mxu0 %v2168_v15 }
  0xab   :  { %v2349_v11 = vunpack.i.h.bf16 %v2347_v24  ;;  %v2348_v31 = vunpack.i.l.bf16 %v2347_v24  ;;  %2171 = vmatpush1.bf16.msra.mxu0 %v2170_v23 }
  0xac   :  { %v2352_v35 = vpop.permute.xlu1 %2351  ;;  %2173 = vmatprep.subr.bf16.mxu0 %v2172_v25 }
  0xad   :  { %v2354_v60 = vunpack.i.h.bf16 %v2352_v35  ;;  %v2353_v37 = vunpack.i.l.bf16 %v2352_v35  ;;  %2159 = vmatpush1.bf16.msra.mxu1 %v2735_v8  ;;  %v72_v62 = vsel %vm69_vm0, %v2334_v56, %v2348_v31  ;;  %v70_v8 = vsel %vm69_vm0, %v2349_v11, %v2303_v29 }
  0xae   :  { %v117_v38 = vpop.permute.xlu0 %116  ;;  %476 = vmatprep.subr.mxu1 %v125_v28  ;;  %v2176_v28 = vpack.c.bf16 %v2615_v16, %v72_v62  ;;  %v71_v46 = vsel %vm69_vm0, %v2348_v31, %v2349_v11  ;;  %v2192_v27 = vpack.c.bf16 %v2540_v4, %v70_v8  ;;  %v756_v31 = vsub.s32 2, %v747_v53 }
  0xaf   :  { %v163_v22 = vsel %vm161_vm2, %v2353_v37, %v2354_v60  ;;  %v122_v10 = vsel %vm120_vm1, %v115_v21, %v117_v38  ;;  %2175 = vmatpush1.bf16.msra.mxu0 %v2752_v18  ;;  %v164_v18 = vsel %vm161_vm2, %v2759_v26, %v2353_v37  ;;  %v2188_v26 = vpack.c.bf16 %v2620_v17, %v71_v46 }
  0xb0   :  { %v160_v32 = vpop.permute.xlu1 %159  ;;  %547 = vmatprep.subr.mxu0 %v123_v40  ;;  %v2180_v34 = vpack.c.bf16 %v163_v22, %v122_v10  ;;  %v2182_v47 = vpack.c.bf16 %v164_v18, %v123_v40  ;;  %v760_v35 = vsub.s32 3, %v747_v53  ;;  %v768_v37 = vsub.s32 5, %v747_v53 }
  0xb1   :  { %477 = vmatpush1.msra.mxu1 %v2764_v9  ;;  %v171_v16 = vsel %vm161_vm2, %v160_v32, %v2313_v41  ;;  %v162_v4 = vsel %vm161_vm2, %v2354_v60, %v160_v32 }
  0xb2   :  { %v119_v36 = vpop.permute.xlu0 %118  ;;  %2114 = vmatmul.mubr.msk.f32.vlgmr.msra.gmra.mrb[0].mxu1 %vm385_vm5, %v2749_v7  ;;  %2177 = vmatprep.subr.bf16.mxu1 %v2176_v28 }
  0xb3   :  { %v130_v29 = vsel %vm120_vm1, %v119_v36, %v2657_v30  ;;  %548 = vmatpush1.msra.mxu0 %v2782_v45  ;;  %2179 = vmatpush1.bf16.msra.mxu1 %v2172_v25  ;;  %v121_v39 = vsel %vm120_vm1, %v117_v38, %v119_v36 }
  0xb4   :  { %v2196_v9 = vpack.c.bf16 %v171_v16, %v130_v29  ;;  %2181 = vmatprep.subr.bf16.mxu1 %v2180_v34  ;;  %2193 = vmatprep.subr.bf16.mxu0 %v2192_v27  ;;  %v199_v30 = vpop.permute.xlu1 %198  ;;  %v2198_v17 = vpack.c.bf16 %v162_v4, %v121_v39  ;;  %v46_v4 = vld [vmem:[%s3406_s1 + $0x8] sm:$0x3] }
  0xb5   :  { %2115 = vmatmul.mubr.msk.f32.vlgmr.msra.gmra.mrb[2].mxu0 %vm385_vm5, %v2749_v7  ;;  %666 = vmatprep.mubr.f32.mxu1 %v3418_v13 }
  0xb6   :  { %2195 = vmatpush1.bf16.msra.mxu0 %v2188_v26  ;;  %v197_v41 = vpop.permute.xlu0 %196  ;;  %737 = vmatprep.mubr.f32.mxu0 %v3418_v13 }
  0xb7   :  { %2197 = vmatprep.subr.bf16.mxu0 %v2196_v9  ;;  %2183 = vmatpush1.bf16.msra.mxu1 %v2182_v47  ;;  %v2872_v56 = vsel %vm202_vm3, %v197_v41, %v199_v30  ;;  %v2877_v57 = vsel %vm202_vm3, %v2810_v6, %v197_v41  ;;  %v776_v9 = vsub.s32 7, %v747_v53 }
  0xb8   :  { %v201_v52 = vpop.permute.xlu1 %200 }
  0xb9   :  { %v2888_v12 = vsel %vm202_vm3, %v199_v30, %v201_v52  ;;  %v2893_v6 = vsel %vm202_vm3, %v201_v52, %v2714_v55 }
  0xba   :  { %2199 = vmatpush1.bf16.msra.mxu0 %v2198_v17  ;;  %v2357_v45 = vpop.permute.xlu0 %2356 }
  0xbb   :  { %v2359_v49 = vunpack.i.h.bf16 %v2357_v45  ;;  %v2358_v50 = vunpack.i.l.bf16 %v2357_v45 }
  0xbd   :  { %v246_v59 = vsel %vm243_vm4, %v2792_v63, %v2358_v50  ;;  %v245_v1 = vsel %vm243_vm4, %v2358_v50, %v2359_v49 }
  0xbe   :  { %v2186_v3 = vpack.c.bf16 %v246_v59, %v2877_v57  ;;  %v242_v48 = vpop.permute.xlu0 %241  ;;  %v2184_v2 = vpack.c.bf16 %v245_v1, %v2872_v56 }
  0xbf   :  { %v244_v63 = vsel %vm243_vm4, %v2359_v49, %v242_v48  ;;  %v253_v42 = vsel %vm243_vm4, %v242_v48, %v2323_v54  ;;  %v45_v54 = vld [vmem:[%s3406_s1] sm:$0xff] }
  0xc0   :  { %v2200_v14 = vpack.c.bf16 %v253_v42, %v2893_v6  ;;  %v2202_v15 = vpack.c.bf16 %v244_v63, %v2888_v12  ;;  %2185 = vmatprep.subr.bf16.mxu1 %v2184_v2  ;;  %v2921_v60 = vrot.slane %v45_v54, %v756_v31  ;;  %v2923_v62 = vrot.slane %v45_v54, %v760_v35 }
  0xc1   :  { %2187 = vmatpush1.bf16.msra.mxu1 %v2186_v3  ;;  %v2925_v22 = vrot.slane %v45_v54, %v764_v19  ;;  %v2928_v8 = vrot.slane %v45_v54, %v768_v37 }
  0xc2   :  { %2189 = vmatprep.subr.bf16.mxu1 %v2188_v26  ;;  %2201 = vmatprep.subr.bf16.mxu0 %v2200_v14  ;;  %v772_v26 = vsub.s32 6, %v747_v53 }
  0xc3   :  { %2203 = vmatpush1.bf16.msra.mxu0 %v2202_v15 }
  0xc4   :  { %2205 = vmatprep.subr.bf16.mxu0 %v2667_v33  ;;  %v748_v33 = vsub.s32 0, %v747_v53  ;;  %v2936_v47 = vrot.slane %v45_v54, %v772_v26 }
  0xc5   :  { %2191 = vmatpush1.bf16.msra.mxu1 %v2176_v28 }
  0xc6   :  { %618 = vmatprep.subr.mxu1 %v121_v39  ;;  %v2915_v55 = vrot.slane %v45_v54, %v748_v33  ;;  %v2938_v39 = vrot.slane %v45_v54, %v776_v9  ;;  %v2940_v30 = vrot.slane %v46_v4, %v748_v33 }
  0xc7   :  { %2207 = vmatpush1.bf16.msra.mxu0 %v2192_v27 }
  0xc8   :  { %689 = vmatprep.subr.mxu0 %v2689_v43  ;;  %v752_v43 = vsub.s32 1, %v747_v53  ;;  %3427 = vst [vmem:[#allocation4_spill] sm:$0xff] %v2940_v30 }
  0xc9   :  { %619 = vmatpush1.msra.mxu1 %v122_v10 }
  0xca   :  { %2116 = vmatmul.mubr.msk.f32.vlgmr.msra.gmra.mrb[2].mxu1 %vm385_vm5, %v2749_v7  ;;  %v2917_v21 = vrot.slane %v45_v54, %v752_v43  ;;  %v2945_v3 = vrot.slane %v46_v4, %v752_v43 }
  0xcb   :  { %690 = vmatpush1.msra.mxu0 %v130_v29  ;;  %1313 = vmatprep.mubr.f32.mxu1 %v3418_v13 }
  0xcc   :  { %2117 = vmatmul.mubr.msk.f32.vlgmr.msra.gmra.mrb[4].mxu0 %vm385_vm5, %v2749_v7  ;;  %3428 = vst [vmem:[#allocation5_spill] sm:$0xff] %v2945_v3 }
  0xcd   :  { %1384 = vmatprep.mubr.f32.mxu0 %v3418_v13 }
 0x16a   :  { %v455_v23 = vpop.f32.mrb[0].mxu0 }
 0x16b   :  { %v796_v24 = vmul.f32 %v2915_v55, %v455_v23  ;;  %v457_v25 = vpop.f32.mrb[1].mxu0 }
 0x16c   :  { %v797_v7 = vmul.f32 %v2917_v21, %v457_v25 }
 0x16e   :  { %v806_v11 = vadd.f32 %v797_v7, %v796_v24 }
 0x185   :  { %v526_v38 = vpop.f32.mrb[0].mxu1 }
 0x186   :  { %v798_v10 = vmul.f32 %v2921_v60, %v526_v38  ;;  %v528_v40 = vpop.f32.mrb[1].mxu1 }
 0x187   :  { %v799_v32 = vmul.f32 %v2923_v62, %v528_v40 }
 0x188   :  { %v807_v28 = vadd.f32 %v806_v11, %v798_v10  ;;  %v597_v46 = vpop.f32.mrb[2].mxu0 }
 0x189   :  { %v800_v34 = vmul.f32 %v2925_v22, %v597_v46  ;;  %v599_v18 = vpop.f32.mrb[3].mxu0 }
 0x18a   :  { %v808_v36 = vadd.f32 %v807_v28, %v799_v32  ;;  %v801_v27 = vmul.f32 %v2928_v8, %v599_v18 }
 0x18c   :  { %v809_v16 = vadd.f32 %v808_v36, %v800_v34 }
 0x18e   :  { %v810_v29 = vadd.f32 %v809_v16, %v801_v27 }
 0x19d   :  { %v668_v41 = vpop.f32.mrb[2].mxu1 }
 0x19e   :  { %v802_v17 = vmul.f32 %v2936_v47, %v668_v41  ;;  %v670_v45 = vpop.f32.mrb[3].mxu1 }
 0x19f   :  { %v803_v49 = vmul.f32 %v2938_v39, %v670_v45  ;;  %v739_v50 = vpop.f32.mrb[4].mxu0 }
 0x1a0   :  { %v811_v52 = vadd.f32 %v810_v29, %v802_v17  ;;  %v804_v59 = vmul.f32 %v2940_v30, %v739_v50  ;;  %v741_v1 = vpop.f32.mrb[5].mxu0 }
 0x1a1   :  { %v805_v2 = vmul.f32 %v2945_v3, %v741_v1 }
 0x1a2   :  { %v812_v48 = vadd.f32 %v811_v52, %v803_v49 }
 0x1a4   :  { %v813_v63 = vadd.f32 %v812_v48, %v804_v59 }
 0x1a6   :  { %v814_v42 = vadd.f32 %v813_v63, %v805_v2 }
 0x1a8   :  { %815 = vadd.xlane.f32.xlu1 %v814_v42  ;;  %v2462_v42 = vmov 0  }
 0x1a9   :  { %2360 = vset.pattern.permute.xlu0 %v2462_v42  ;;  %2361 = vset.pattern.permute.xlu1 %v2462_v42 }
 0x235   :  { %v816_v14 = vpop.xlane.xlu1 %815 }
 0x236   :  { %v817_v15 = vmul.f32 0.001953125, %v816_v14  ;;  %v879_v14 = vld [vmem:[%s3407_s4] sm:$0xff] }
 0x237   :  { %882 = vperm.xlu1 %2361, %v879_v14  }
 0x238   :  { %v818_v53 = vsub.f32 %v455_v23, %v817_v15  ;;  %v819_v33 = vsub.f32 %v457_v25, %v817_v15  ;;  %v820_v54 = vsub.f32 %v526_v38, %v817_v15  ;;  %v821_v24 = vsub.f32 %v528_v40, %v817_v15 }
 0x239   :  { %v822_v31 = vsub.f32 %v597_v46, %v817_v15  ;;  %v823_v19 = vsub.f32 %v599_v18, %v817_v15  ;;  %v824_v32 = vsub.f32 %v668_v41, %v817_v15  ;;  %v2951_v27 = vsub.f32 %v670_v45, %v817_v15 }
 0x23a   :  { %v828_v7 = vmul.f32 %v818_v53, %v818_v53  ;;  %v829_v11 = vmul.f32 %v819_v33, %v819_v33  ;;  %v830_v35 = vmul.f32 %v820_v54, %v820_v54  ;;  %v831_v37 = vmul.f32 %v821_v24, %v821_v24 }
 0x23b   :  { %v832_v28 = vmul.f32 %v822_v31, %v822_v31  ;;  %v833_v23 = vmul.f32 %v823_v19, %v823_v19  ;;  %v2954_v40 = vsub.f32 %v739_v50, %v817_v15  ;;  %v834_v46 = vmul.f32 %v824_v32, %v824_v32 }
 0x23c   :  { %v838_v43 = vmul.f32 %v828_v7, %v2915_v55  ;;  %v839_v10 = vmul.f32 %v829_v11, %v2917_v21  ;;  %v840_v34 = vmul.f32 %v830_v35, %v2921_v60  ;;  %v841_v25 = vmul.f32 %v831_v37, %v2923_v62  ;;  %v862_v35 = vld [vmem:[%s3408_s3] sm:$0xff] }
 0x23d   :  { %v842_v18 = vmul.f32 %v832_v28, %v2925_v22  ;;  %v827_v29 = vsub.f32 %v741_v1, %v817_v15  ;;  %v835_v26 = vmul.f32 %v2951_v27, %v2951_v27  ;;  %v843_v9 = vmul.f32 %v833_v23, %v2928_v8 }
 0x23e   :  { %v848_v36 = vadd.f32 %v839_v10, %v838_v43  ;;  %v836_v41 = vmul.f32 %v2954_v40, %v2954_v40  ;;  %v844_v17 = vmul.f32 %v834_v46, %v2936_v47 }
 0x23f   :  { %v837_v49 = vmul.f32 %v827_v29, %v827_v29  ;;  %v845_v50 = vmul.f32 %v835_v26, %v2938_v39 }
 0x240   :  { %v849_v38 = vadd.f32 %v848_v36, %v840_v34  ;;  %v846_v59 = vmul.f32 %v836_v41, %v2940_v30 }
 0x241   :  { %v847_v1 = vmul.f32 %v837_v49, %v2945_v3 }
 0x242   :  { %v850_v16 = vadd.f32 %v849_v38, %v841_v25 }
 0x244   :  { %v851_v4 = vadd.f32 %v850_v16, %v842_v18 }
 0x246   :  { %v852_v45 = vadd.f32 %v851_v4, %v843_v9 }
 0x248   :  { %v853_v52 = vadd.f32 %v852_v45, %v844_v17 }
 0x24a   :  { %v854_v48 = vadd.f32 %v853_v52, %v845_v50 }
 0x24c   :  { %v855_v2 = vadd.f32 %v854_v48, %v846_v59 }
 0x24e   :  { %v856_v63 = vadd.f32 %v855_v2, %v847_v1 }
 0x250   :  { %857 = vadd.xlane.f32.xlu0 %v856_v63 }
 0x2b6   :  { %v883_v28 = vpop.permute.xlu1 %882 }
 0x2dd   :  { %v858_v15 = vpop.xlane.xlu0 %857 }
 0x2de   :  { %v859_v7 = vmul.f32 0.001953125, %v858_v15 }
 0x2e0   :  { %v860_v11 = vadd.f32 1e-05, %v859_v7 }
 0x2e2   :  { %2452 = vrsqrt.f32 %v860_v11 }
 0x2ec   :  { %v2453_v37 = vpop.eup %2452 }
 0x2ed   :  { %v863_v43 = vmul.f32 %v2453_v37, %v862_v35 }
 0x2ef   :  { %866 = vperm.xlu0 %2360, %v863_v43  }
 0x36e   :  { %v867_v10 = vpop.permute.xlu0 %866 }
 0x36f   :  { %v878_v34 = vmul.f32 %v867_v10, %v827_v29  ;;  %v869_v36 = vmul.f32 %v867_v10, %v818_v53  ;;  %v870_v23 = vmul.f32 %v867_v10, %v819_v33  ;;  %v871_v25 = vmul.f32 %v867_v10, %v820_v54 }
 0x370   :  { %v872_v38 = vmul.f32 %v867_v10, %v821_v24  ;;  %v873_v46 = vmul.f32 %v867_v10, %v822_v31  ;;  %v874_v18 = vmul.f32 %v867_v10, %v823_v19  ;;  %v875_v16 = vmul.f32 %v867_v10, %v824_v32 }
 0x371   :  { %v894_v26 = vadd.f32 %v883_v28, %v878_v34  ;;  %v885_v9 = vadd.f32 %v883_v28, %v869_v36  ;;  %v886_v4 = vadd.f32 %v883_v28, %v870_v23  ;;  %v887_v41 = vadd.f32 %v883_v28, %v871_v25 }
 0x372   :  { %v888_v17 = vadd.f32 %v883_v28, %v872_v38  ;;  %v889_v45 = vadd.f32 %v883_v28, %v873_v46  ;;  %v890_v29 = vadd.f32 %v883_v28, %v874_v18  ;;  %v891_v53 = vadd.f32 %v883_v28, %v875_v16 }
 0x373   :  { %v904_v49 = vmax.f32 %v894_v26, 0.0  ;;  %v895_v50 = vmax.f32 %v885_v9, 0.0  ;;  %v896_v52 = vmax.f32 %v886_v4, 0.0  ;;  %v897_v59 = vmax.f32 %v887_v41, 0.0 }
 0x374   :  { %v898_v48 = vmax.f32 %v888_v17, 0.0  ;;  %v899_v1 = vmax.f32 %v889_v45, 0.0  ;;  %v900_v32 = vmax.f32 %v890_v29, 0.0  ;;  %v901_v14 = vmax.f32 %v891_v53, 0.0 }
 0x375   :  { %v2973_v33 = vmul.f32 %v904_v49, %v2945_v3  ;;  %v2976_v54 = vmul.f32 %v895_v50, %v2915_v55  ;;  %v2979_v24 = vmul.f32 %v896_v52, %v2917_v21  ;;  %v2982_v31 = vmul.f32 %v897_v59, %v2921_v60 }
 0x376   :  { %v2992_v63 = vmul.f32 %v898_v48, %v2923_v62  ;;  %v2995_v42 = vmul.f32 %v899_v1, %v2925_v22  ;;  %v3002_v7 = vmul.f32 %v900_v32, %v2928_v8  ;;  %v3005_v11 = vmul.f32 %v901_v14, %v2936_v47 }
 0x377   :  { %1013 = vrot.lane.b32.xlu0 %v2973_v33, %s2460_s27  ;;  %v2362_v19 = vpack.i.bf16 %v2979_v24, %v2976_v54  ;;  %v2392_v2 = vpack.i.bf16 %v2982_v31, %v2979_v24  ;;  %v2372_v35 = vpack.i.bf16 %v2982_v31, %v2973_v33  ;;  %v876_v43 = vmul.f32 %v867_v10, %v2951_v27 }
 0x378   :  { %v2402_v15 = vpack.i.bf16 %v2995_v42, %v2992_v63  ;;  %v2412_v37 = vpack.i.bf16 %v3005_v11, %v3002_v7  ;;  %v877_v34 = vmul.f32 %v867_v10, %v2954_v40  ;;  %v2427_v27 = vpack.i.bf16 %v3002_v7, %v2995_v42 }
 0x379   :  { %2363 = vrot.lane.b32.xlu1 %v2362_v19, %s2458_s25  ;;  %v892_v36 = vadd.f32 %v883_v28, %v876_v43  ;;  %v2397_v46 = vpack.i.bf16 %v2992_v63, %v2976_v54 }
 0x37a   :  { %v893_v23 = vadd.f32 %v883_v28, %v877_v34 }
 0x37b   :  { %2393 = vrot.lane.b32.xlu0 %v2392_v2, %s2456_s19  ;;  %v902_v25 = vmax.f32 %v892_v36, 0.0 }
 0x37c   :  { %v903_v38 = vmax.f32 %v893_v23, 0.0 }
 0x37d   :  { %2368 = vrot.lane.b32.xlu1 %v2362_v19, %s2459_s26  ;;  %v3030_v40 = vmul.f32 %v902_v25, %v2938_v39 }
 0x37e   :  { %v3033_v10 = vmul.f32 %v903_v38, %v2940_v30 }
 0x37f   :  { %2403 = vrot.lane.b32.xlu0 %v2402_v15, %s2458_s25  ;;  %v2442_v18 = vpack.i.bf16 %v3030_v40, %v3005_v11 }
 0x380   :  { %v2432_v28 = vpack.i.bf16 %v3033_v10, %v3030_v40 }
 0x381   :  { %2373 = vrot.lane.b32.xlu1 %v2372_v35, %s2458_s25 }
 0x383   :  { %2413 = vrot.lane.b32.xlu0 %v2412_v37, %s2458_s25 }
 0x385   :  { %2378 = vrot.lane.b32.xlu1 %v2372_v35, %s2459_s26 }
 0x387   :  { %999 = vrot.lane.b32.xlu0 %v2982_v31, %s2460_s27 }
 0x389   :  { %995 = vrot.lane.b32.xlu1 %v2976_v54, %s2460_s27 }
 0x38b   :  { %2423 = vrot.lane.b32.xlu0 %v2402_v15, %s2457_s22 }
 0x38d   :  { %997 = vrot.lane.b32.xlu1 %v2979_v24, %s2460_s27 }
 0x38f   :  { %1005 = vrot.lane.b32.xlu0 %v3002_v7, %s2460_s27 }
 0x391   :  { %2383 = vrot.lane.b32.xlu1 %v2362_v19, %s2457_s22 }
 0x393   :  { %2428 = vrot.lane.b32.xlu0 %v2427_v27, %s2456_s19 }
 0x395   :  { %2388 = vrot.lane.b32.xlu1 %v2372_v35, %s2457_s22 }
 0x397   :  { %2433 = vrot.lane.b32.xlu0 %v2432_v28, %s2458_s25 }
 0x399   :  { %2398 = vrot.lane.b32.xlu1 %v2397_v46, %s2456_s19 }
 0x39b   :  { %1007 = vrot.lane.b32.xlu0 %v3005_v11, %s2460_s27 }
 0x39d   :  { %2408 = vrot.lane.b32.xlu1 %v2402_v15, %s2459_s26 }
 0x39f   :  { %2443 = vrot.lane.b32.xlu0 %v2442_v18, %s2457_s22 }
 0x3a1   :  { %2418 = vrot.lane.b32.xlu1 %v2412_v37, %s2459_s26 }
 0x3a3   :  { %1051 = vrot.lane.b32.xlu0 %v3033_v10, %s2457_s22 }
 0x3a5   :  { %1001 = vrot.lane.b32.xlu1 %v2992_v63, %s2460_s27 }
 0x3a7   :  { %1103 = vrot.lane.b32.xlu0 %v2973_v33, %s2456_s19 }
 0x3a9   :  { %1003 = vrot.lane.b32.xlu1 %v2995_v42, %s2460_s27 }
 0x3ad   :  { %1045 = vrot.lane.b32.xlu1 %v3002_v7, %s2457_s22 }
 0x3b1   :  { %1097 = vrot.lane.b32.xlu1 %v3005_v11, %s2456_s19 }
 0x3b5   :  { %2438 = vrot.lane.b32.xlu1 %v2432_v28, %s2459_s26 }
 0x3b9   :  { %1009 = vrot.lane.b32.xlu1 %v3030_v40, %s2460_s27 }
 0x3bd   :  { %1011 = vrot.lane.b32.xlu1 %v3033_v10, %s2460_s27 }
 0x3c1   :  { %2448 = vrot.lane.b32.xlu1 %v2432_v28, %s2456_s19 }
 0x3e9   :  { %v3068_v16 = vpop.permute.xlu0 %1013 }
 0x3eb   :  { %v2364_v26 = vpop.permute.xlu1 %2363 }
 0x3ec   :  { %v2366_v4 = vunpack.i.h.bf16 %v2364_v26  ;;  %v2365_v41 = vunpack.i.l.bf16 %v2364_v26 }
 0x3ed   :  { %v3070_v9 = vpop.permute.xlu0 %2393 }
 0x3ee   :  { %v943_v50 = vsel %vm161_vm2, %v2365_v41, %v2366_v4  ;;  %v3420_v25 = vunpack.i.h.bf16 %v3070_v9  ;;  %v2395_v38 = vunpack.i.l.bf16 %v3070_v9 }
 0x3ef   :  { %v2369_v17 = vpop.permute.xlu1 %2368 }
 0x3f0   :  { %v2371_v45 = vunpack.i.h.bf16 %v2369_v17  ;;  %v2370_v49 = vunpack.i.l.bf16 %v2369_v17 }
 0x3f1   :  { %v3076_v59 = vpop.permute.xlu0 %2403 }
 0x3f2   :  { %v983_v52 = vsel %vm202_vm3, %v2370_v49, %v2371_v45  ;;  %v2405_v13 = vunpack.i.l.bf16 %v3076_v59 }
 0x3f3   :  { %v3078_v48 = vpop.permute.xlu1 %2373  ;;  %v2208_v1 = vpack.c.bf16 %v983_v52, %v943_v50 }
 0x3f4   :  { %v3415_v29 = vunpack.i.l.bf16 %v3078_v48 }
 0x3f5   :  { %2209 = vmatprep.subr.bf16.mxu1 %v2208_v1  ;;  %v3084_v32 = vpop.permute.xlu0 %2413 }
 0x3f6   :  { %v944_v2 = vsel %vm161_vm2, %v3415_v29, %v2365_v41 }
 0x3f7   :  { %v3081_v53 = vpop.permute.xlu1 %2378 }
 0x3f8   :  { %v3417_v19 = vunpack.i.l.bf16 %v3081_v53  ;;  %v2381_v17 = vunpack.i.h.bf16 %v3081_v53 }
 0x3f9   :  { %v3097_v37 = vpop.permute.xlu0 %999 }
 0x3fa   :  { %v984_v14 = vsel %vm202_vm3, %v3417_v19, %v2370_v49  ;;  %v1112_v49 = vsel %vm120_vm1, %v2395_v38, %v3420_v25 }
 0x3fb   :  { %v3094_v15 = vpack.c.bf16 %v984_v14, %v944_v2  ;;  %v996_v35 = vpop.permute.xlu1 %995  ;;  %v2376_v2 = vunpack.i.h.bf16 %v3078_v48  ;;  %v2216_v29 = vpack.c.bf16 %v1112_v49, %v2979_v24  ;;  %v3424_v49 = vunpack.i.l.bf16 %v3084_v32 }
 0x3fc   :  { %v3118_v50 = vsel %vm243_vm4, %v3068_v16, %v996_v35 }
 0x3fd   :  { %2211 = vmatpush1.bf16.msra.mxu1 %v3094_v15  ;;  %v3101_v27 = vpop.permute.xlu0 %2423 }
 0x3ff   :  { %v998_v43 = vpop.permute.xlu1 %997 }
 0x400   :  { %v1023_v28 = vsel %vm243_vm4, %v996_v35, %v998_v43  ;;  %v982_v35 = vsel %vm202_vm3, %v2371_v45, %v2381_v17 }
 0x401   :  { %v3125_v14 = vpop.permute.xlu0 %1005 }
 0x403   :  { %v2384_v34 = vpop.permute.xlu1 %2383 }
 0x404   :  { %v2386_v36 = vunpack.i.h.bf16 %v2384_v34  ;;  %v2385_v23 = vunpack.i.l.bf16 %v2384_v34 }
 0x406   :  { %v1063_v46 = vsel %vm69_vm0, %v2385_v23, %v2386_v36 }
 0x407   :  { %v3107_v18 = vpop.permute.xlu1 %2388  ;;  %v2212_v26 = vpack.c.bf16 %v1063_v46, %v1023_v28 }
 0x408   :  { %v3416_v41 = vunpack.i.l.bf16 %v3107_v18 }
 0x409   :  { %2213 = vmatprep.subr.bf16.mxu1 %v2212_v26 }
 0x40a   :  { %v1064_v52 = vsel %vm69_vm0, %v3416_v41, %v2385_v23 }
 0x40b   :  { %v2214_v34 = vpack.c.bf16 %v1064_v52, %v3118_v50  ;;  %v3128_v46 = vpop.permute.xlu1 %2398  ;;  %v942_v52 = vsel %vm161_vm2, %v2366_v4, %v2376_v2  ;;  %v2391_v4 = vunpack.i.h.bf16 %v3107_v18 }
 0x40c   :  { %v3421_v26 = vunpack.i.l.bf16 %v3128_v46  ;;  %v2220_v24 = vpack.c.bf16 %v982_v35, %v942_v52  ;;  %v2401_v52 = vunpack.i.h.bf16 %v3128_v46 }
 0x40d   :  { %2215 = vmatpush1.bf16.msra.mxu1 %v2214_v34  ;;  %v3143_v34 = vpop.permute.xlu0 %2428 }
 0x40e   :  { %v1113_v23 = vsel %vm120_vm1, %v3421_v26, %v2395_v38  ;;  %2217 = vmatprep.subr.bf16.mxu1 %v2216_v29  ;;  %v941_v29 = vsel %vm161_vm2, %v2376_v2, %v2405_v13  ;;  %v2406_v38 = vunpack.i.h.bf16 %v3076_v59 }
 0x40f   :  { %v2218_v41 = vpack.c.bf16 %v1113_v23, %v2976_v54  ;;  %v2409_v19 = vpop.permute.xlu1 %2408 }
 0x410   :  { %v2410_v25 = vunpack.i.l.bf16 %v2409_v19  ;;  %v2411_v45 = vunpack.i.h.bf16 %v2409_v19  ;;  %v1022_v19 = vsel %vm243_vm4, %v998_v43, %v3097_v37  ;;  %v939_v59 = vsel %vm161_vm2, %v2406_v38, %v3424_v49  ;;  %v3177_v49 = vld [vmem:[%s3409_s5] sm:$0xff] }
 0x411   :  { %2219 = vmatpush1.bf16.msra.mxu1 %v2218_v41  ;;  %v2425_v41 = vunpack.i.l.bf16 %v3101_v27  ;;  %v1062_v43 = vsel %vm69_vm0, %v2386_v36, %v2391_v4 }
 0x412   :  { %2221 = vmatprep.subr.bf16.mxu1 %v2220_v24  ;;  %v981_v54 = vsel %vm202_vm3, %v2381_v17, %v2410_v25  ;;  %v2430_v17 = vunpack.i.l.bf16 %v3143_v34  ;;  %v980_v2 = vsel %vm202_vm3, %v2410_v25, %v2411_v45  ;;  %v940_v25 = vsel %vm161_vm2, %v2405_v13, %v2406_v38 }
 0x413   :  { %v3151_v23 = vpop.permute.xlu1 %2418  ;;  %v2224_v35 = vpack.c.bf16 %v981_v54, %v941_v29  ;;  %v3168_v29 = vpop.permute.xlu0 %2433  ;;  %v2230_v30 = vpack.c.bf16 %v1062_v43, %v1022_v19  ;;  %v3429_v13 = vunpack.i.h.bf16 %v3070_v9 }
 0x414   :  { %v2420_v26 = vunpack.i.l.bf16 %v3151_v23  ;;  %v1110_v36 = vsel %vm120_vm1, %v2401_v52, %v2430_v17 }
 0x415   :  { %2223 = vmatpush1.bf16.msra.mxu1 %v2208_v1  ;;  %2225 = vmatprep.subr.bf16.mxu0 %v2224_v35 }
 0x416   :  { %1265 = vmatprep.subr.mxu1 %v1022_v19  ;;  %2227 = vmatpush1.bf16.msra.mxu0 %v2220_v24  ;;  %v979_v1 = vsel %vm202_vm3, %v2411_v45, %v2420_v26  ;;  %v1061_v45 = vsel %vm69_vm0, %v2391_v4, %v2425_v41  ;;  %v2232_v4 = vpack.c.bf16 %v1110_v36, %v2992_v63 }
 0x417   :  { %v1002_v54 = vpop.permute.xlu1 %1001  ;;  %v3172_v3 = vpack.c.bf16 %v979_v1, %v939_v59  ;;  %v2236_v59 = vpack.c.bf16 %v980_v2, %v940_v25  ;;  %v3430_v2 = vmov 0.0   ;;  %v1008_v19 = vpop.permute.xlu0 %1007  ;;  %v2431_v25 = vunpack.i.h.bf16 %v3143_v34 }
 0x418   :  { %v1021_v24 = vsel %vm243_vm4, %v3097_v37, %v1002_v54  ;;  %v1111_v37 = vsel %vm120_vm1, %v3429_v13, %v2401_v52  ;;  %v2416_v34 = vunpack.i.h.bf16 %v3084_v32 }
 0x419   :  { %v2228_v1 = vpack.c.bf16 %v1061_v45, %v1021_v24  ;;  %1266 = vmatpush1.msra.mxu1 %v1023_v28  ;;  %v2426_v28 = vunpack.i.h.bf16 %v3101_v27  ;;  %v2234_v43 = vpack.c.bf16 %v1111_v37, %v2982_v31  ;;  %v2421_v45 = vunpack.i.h.bf16 %v3151_v23 }
 0x41a   :  { %2241 = vmatprep.subr.bf16.mxu1 %v3172_v3  ;;  %2118 = vmatmul.mubr.msk.f32.vlgmr.msra.gmra.mrb[4].mxu1 %vm385_vm5, %v3177_v49 }
 0x41b   :  { %v1004_v38 = vpop.permute.xlu1 %1003  ;;  %2229 = vmatprep.subr.bf16.mxu0 %v2228_v1  ;;  %2243 = vmatpush1.bf16.msra.mxu1 %v2236_v59  ;;  %v1060_v27 = vsel %vm69_vm0, %v2425_v41, %v2426_v28  ;;  %v2444_v23 = vpop.permute.xlu0 %2443  ;;  %v978_v41 = vsel %vm202_vm3, %v2420_v26, %v2421_v45 }
 0x41c   :  { %2231 = vmatpush1.bf16.msra.mxu0 %v2230_v30  ;;  %1455 = vmatprep.mubr.f32.mxu1 %v3430_v2  ;;  %v1020_v9 = vsel %vm243_vm4, %v1002_v54, %v1004_v38  ;;  %v1019_v30 = vsel %vm243_vm4, %v1004_v38, %v3125_v14  ;;  %v1109_v54 = vsel %vm120_vm1, %v2430_v17, %v2431_v25  ;;  %v2435_v17 = vunpack.i.l.bf16 %v3168_v29 }
 0x41d   :  { %2233 = vmatprep.subr.bf16.mxu0 %v2232_v4  ;;  %v2246_v36 = vpack.c.bf16 %v1060_v27, %v1020_v9  ;;  %v2250_v37 = vpack.c.bf16 %v1109_v54, %v2995_v42  ;;  %v3431_v38 = vunpack.i.l.bf16 %v3084_v32  ;;  %v2436_v42 = vunpack.i.h.bf16 %v3168_v29 }
 0x41e   :  { %v937_v32 = vsel %vm161_vm2, %v2416_v34, %v2435_v17  ;;  %v1018_v29 = vsel %vm243_vm4, %v3125_v14, %v1008_v19 }
 0x41f   :  { %v1046_v52 = vpop.permute.xlu1 %1045  ;;  %v938_v4 = vsel %vm161_vm2, %v3431_v38, %v2416_v34  ;;  %v3432_v34 = vunpack.i.l.bf16 %v3081_v53  ;;  %v936_v53 = vsel %vm161_vm2, %v2435_v17, %v2436_v42 }
 0x420   :  { %v1059_v63 = vsel %vm69_vm0, %v2426_v28, %v1046_v52  ;;  %2235 = vmatpush1.bf16.msra.mxu0 %v2234_v43  ;;  %v2252_v43 = vpack.c.bf16 %v978_v41, %v938_v4 }
 0x421   :  { %v2244_v31 = vpack.c.bf16 %v1059_v63, %v1019_v30  ;;  %2237 = vmatprep.subr.bf16.mxu0 %v2236_v59 }
 0x423   :  { %v3213_v1 = vpop.permute.xlu1 %1097  ;;  %2245 = vmatprep.subr.bf16.mxu1 %v2244_v31 }
 0x424   :  { %v1108_v13 = vsel %vm120_vm1, %v2431_v25, %v3213_v1  ;;  %2239 = vmatpush1.bf16.msra.mxu0 %v2224_v35  ;;  %2247 = vmatpush1.bf16.msra.mxu1 %v2246_v36  ;;  %v2446_v35 = vunpack.i.h.bf16 %v2444_v23  ;;  %v2445_v25 = vunpack.i.l.bf16 %v2444_v23 }
 0x425   :  { %v2248_v59 = vpack.c.bf16 %v1108_v13, %v3002_v7  ;;  %1336 = vmatprep.subr.mxu0 %v1020_v9  ;;  %v1052_v7 = vpop.permute.xlu0 %1051 }
 0x426   :  { %v1058_v54 = vsel %vm69_vm0, %v1046_v52, %v2445_v25  ;;  %v3434_v52 = vunpack.i.l.bf16 %v3107_v18  ;;  %v3435_v18 = vunpack.i.l.bf16 %v3128_v46 }
 0x427   :  { %v2439_v28 = vpop.permute.xlu1 %2438  ;;  %2249 = vmatprep.subr.bf16.mxu1 %v2248_v59  ;;  %v2262_v4 = vpack.c.bf16 %v1058_v54, %v1018_v29 }
 0x428   :  { %v2441_v63 = vunpack.i.h.bf16 %v2439_v28  ;;  %v2440_v27 = vunpack.i.l.bf16 %v2439_v28  ;;  %1337 = vmatpush1.msra.mxu0 %v1021_v24  ;;  %2251 = vmatpush1.bf16.msra.mxu1 %v2250_v37  ;;  %v1057_v24 = vsel %vm69_vm0, %v2445_v25, %v2446_v35  ;;  %v1055_v37 = vsel %vm69_vm0, %v1052_v7, %v3434_v52 }
 0x429   :  { %2119 = vmatmul.mubr.msk.f32.vlgmr.msra.gmra.mrb[6].mxu0 %vm385_vm5, %v3177_v49  ;;  %2253 = vmatprep.subr.bf16.mxu1 %v2252_v43  ;;  %v1056_v25 = vsel %vm69_vm0, %v2446_v35, %v1052_v7 }
 0x42a   :  { %v977_v26 = vsel %vm202_vm3, %v2421_v45, %v2440_v27  ;;  %1526 = vmatprep.mubr.f32.mxu0 %v3430_v2  ;;  %v975_v45 = vsel %vm202_vm3, %v2441_v63, %v3432_v34  ;;  %v976_v23 = vsel %vm202_vm3, %v2440_v27, %v2441_v63 }
 0x42b   :  { %v1010_v9 = vpop.permute.xlu1 %1009  ;;  %v2256_v31 = vpack.c.bf16 %v977_v26, %v937_v32  ;;  %v2268_v38 = vpack.c.bf16 %v976_v23, %v936_v53 }
 0x42c   :  { %v1017_v36 = vsel %vm243_vm4, %v1008_v19, %v1010_v9  ;;  %2255 = vmatpush1.bf16.msra.mxu1 %v3172_v3  ;;  %v3433_v3 = vunpack.i.l.bf16 %v3078_v48  ;;  %v1104_v19 = vpop.permute.xlu0 %1103 }
 0x42d   :  { %v2260_v13 = vpack.c.bf16 %v1057_v24, %v1017_v36  ;;  %1407 = vmatprep.subr.mxu1 %v1018_v29  ;;  %2257 = vmatprep.subr.bf16.mxu0 %v2256_v31 }
 0x42e   :  { %2259 = vmatpush1.bf16.msra.mxu0 %v2252_v43  ;;  %v935_v14 = vsel %vm161_vm2, %v2436_v42, %v3433_v3  ;;  %v1114_v43 = vsel %vm120_vm1, %v1104_v19, %v3435_v18 }
 0x42f   :  { %v1012_v41 = vpop.permute.xlu1 %1011  ;;  %2261 = vmatprep.subr.bf16.mxu0 %v2260_v13  ;;  %v2272_v59 = vpack.c.bf16 %v975_v45, %v935_v14  ;;  %v2280_v42 = vpack.c.bf16 %v1114_v43, %v2973_v33  ;;  %v3436_v45 = vld [vmem:[#allocation4_spill] sm:$0xff]  ;;  %v3437_v13 = vld [vmem:[#allocation5_spill] sm:$0xff] }
 0x430   :  { %v1015_v48 = vsel %vm243_vm4, %v1012_v41, %v3068_v16  ;;  %1408 = vmatpush1.msra.mxu1 %v1019_v30  ;;  %v1016_v28 = vsel %vm243_vm4, %v1010_v9, %v1012_v41 }
 0x431   :  { %v2276_v17 = vpack.c.bf16 %v1055_v37, %v1015_v48  ;;  %2120 = vmatmul.mubr.msk.f32.vlgmr.msra.gmra.mrb[6].mxu1 %vm385_vm5, %v3177_v49  ;;  %2273 = vmatprep.subr.bf16.mxu1 %v2272_v59  ;;  %v2278_v30 = vpack.c.bf16 %v1056_v25, %v1016_v28 }
 0x432   :  { %2263 = vmatpush1.bf16.msra.mxu0 %v2262_v4  ;;  %2275 = vmatpush1.bf16.msra.mxu1 %v2268_v38 }
 0x433   :  { %v2449_v16 = vpop.permute.xlu1 %2448  ;;  %2277 = vmatprep.subr.bf16.mxu1 %v2276_v17  ;;  %1597 = vmatprep.mubr.f32.mxu1 %v3430_v2 }
 0x434   :  { %v2451_v63 = vunpack.i.h.bf16 %v2449_v16  ;;  %v2450_v27 = vunpack.i.l.bf16 %v2449_v16 }
 0x436   :  { %v1105_v46 = vsel %vm120_vm1, %v2451_v63, %v1104_v19  ;;  %v1107_v32 = vsel %vm120_vm1, %v3213_v1, %v2450_v27  ;;  %2279 = vmatpush1.bf16.msra.mxu1 %v2278_v30  ;;  %v1106_v35 = vsel %vm120_vm1, %v2450_v27, %v2451_v63  ;;  %v1687_v19 = vld [vmem:[%s3411_s7] sm:$0xff] }
 0x437   :  { %v2282_v7 = vpack.c.bf16 %v1105_v46, %v3033_v10  ;;  %v2266_v26 = vpack.c.bf16 %v1107_v32, %v3005_v11  ;;  %2281 = vmatprep.subr.bf16.mxu1 %v2280_v42  ;;  %v2264_v9 = vpack.c.bf16 %v1106_v35, %v3030_v40 }
 0x439   :  { %2265 = vmatprep.subr.bf16.mxu0 %v2264_v9 }
 0x43a   :  { %2267 = vmatpush1.bf16.msra.mxu0 %v2266_v26  ;;  %2283 = vmatpush1.bf16.msra.mxu1 %v2282_v7 }
 0x43b   :  { %2269 = vmatprep.subr.bf16.mxu0 %v2268_v38  ;;  %2285 = vmatprep.subr.bf16.mxu1 %v3094_v15  ;;  %v1714_v38 = vld [vmem:[%s3412_s9] sm:$0xff] }
 0x43e   :  { %2271 = vmatpush1.bf16.msra.mxu0 %v2256_v31  ;;  %2287 = vmatpush1.bf16.msra.mxu1 %v2272_v59 }
 0x43f   :  { %1478 = vmatprep.subr.mxu0 %v1016_v28  ;;  %1549 = vmatprep.subr.mxu1 %v3118_v50 }
 0x442   :  { %1479 = vmatpush1.msra.mxu0 %v1017_v36  ;;  %1550 = vmatpush1.msra.mxu1 %v1015_v48 }
 0x443   :  { %2121 = vmatmul.mubr.msk.f32.vlgmr.msra.gmra.mrb[8].mxu0 %vm385_vm5, %v3177_v49  ;;  %2122 = vmatmul.mubr.msk.f32.vlgmr.msra.gmra.mrb[8].mxu1 %vm385_vm5, %v3177_v49 }
 0x444   :  { %1724 = vmatprep.subr.mxu0 %v2708_v51  ;;  %1795 = vmatprep.subr.mxu1 %v2796_v0 }
 0x445   :  { %1725 = vmatpush1.msra.mxu0 %v2725_v58  ;;  %1796 = vmatpush1.msra.mxu1 %v2790_v61 }
 0x446   :  { %1866 = vmatprep.subr.mxu0 %v2820_v44  ;;  %1937 = vmatprep.subr.mxu1 %v2872_v56 }
 0x447   :  { %1788 = vmatprep.mubr.f32.mxu0 %v3430_v2  ;;  %1859 = vmatprep.mubr.f32.mxu1 %v3430_v2 }
 0x448   :  { %2123 = vmatmul.mubr.msk.f32.vlgmr.msra.gmra.mrb[10].mxu0 %vm1720_vm6, %v1713_v20  ;;  %2124 = vmatmul.mubr.msk.f32.vlgmr.msra.gmra.mrb[10].mxu1 %vm1720_vm6, %v1713_v20 }
 0x449   :  { %1867 = vmatpush1.msra.mxu0 %v2806_v5  ;;  %1938 = vmatpush1.msra.mxu1 %v2877_v57 }
 0x44a   :  { %2008 = vmatprep.subr.mxu0 %v2893_v6  ;;  %1930 = vmatprep.mubr.f32.mxu0 %v3430_v2 }
 0x44b   :  { %2001 = vmatprep.mubr.f32.mxu1 %v3430_v2 }
 0x44c   :  { %2125 = vmatmul.mubr.msk.f32.vlgmr.msra.gmra.mrb[12].mxu0 %vm1720_vm6, %v1713_v20  ;;  %2126 = vmatmul.mubr.msk.f32.vlgmr.msra.gmra.mrb[12].mxu1 %vm1720_vm6, %v1713_v20 }
 0x44d   :  { %2009 = vmatpush1.msra.mxu0 %v2888_v12  ;;  %2072 = vmatprep.mubr.f32.mxu0 %v3430_v2 }
 0x450   :  { %2127 = vmatmul.mubr.msk.f32.vlgmr.msra.gmra.mrb[14].mxu0 %vm1720_vm6, %v1713_v20 }
 0x4ed   :  { %v1315_v51 = vpop.f32.mrb[4].mxu1 }
 0x4ee   :  { %v1604_v58 = vmul.f32 %v1315_v51, %v2915_v55  ;;  %v1317_v61 = vpop.f32.mrb[5].mxu1 }
 0x4ef   :  { %v1605_v0 = vmul.f32 %v1317_v61, %v2917_v21 }
 0x4f1   :  { %v1614_v5 = vadd.f32 %v1605_v0, %v1604_v58 }
 0x4fc   :  { %v1386_v44 = vpop.f32.mrb[6].mxu0 }
 0x4fd   :  { %v1606_v56 = vmul.f32 %v1386_v44, %v2921_v60  ;;  %v1388_v57 = vpop.f32.mrb[7].mxu0 }
 0x4fe   :  { %v1607_v6 = vmul.f32 %v1388_v57, %v2923_v62 }
 0x4ff   :  { %v1615_v33 = vadd.f32 %v1614_v5, %v1606_v56 }
 0x501   :  { %v1616_v11 = vadd.f32 %v1615_v33, %v1607_v6 }
 0x504   :  { %v1457_v12 = vpop.f32.mrb[6].mxu1 }
 0x505   :  { %v1608_v40 = vmul.f32 %v1457_v12, %v2925_v22  ;;  %v1459_v10 = vpop.f32.mrb[7].mxu1 }
 0x506   :  { %v1609_v15 = vmul.f32 %v1459_v10, %v2928_v8 }
 0x507   :  { %v1617_v50 = vadd.f32 %v1616_v11, %v1608_v40 }
 0x509   :  { %v1618_v49 = vadd.f32 %v1617_v50, %v1609_v15 }
 0x516   :  { %v1528_v2 = vpop.f32.mrb[8].mxu0  ;;  %v1599_v1 = vpop.f32.mrb[8].mxu1 }
 0x517   :  { %v1610_v31 = vmul.f32 %v1528_v2, %v2936_v47  ;;  %v1530_v24 = vpop.f32.mrb[9].mxu0  ;;  %v1601_v36 = vpop.f32.mrb[9].mxu1  ;;  %v1612_v54 = vmul.f32 %v1599_v1, %v3436_v45 }
 0x518   :  { %v1611_v29 = vmul.f32 %v1530_v24, %v2938_v39  ;;  %v1613_v3 = vmul.f32 %v1601_v36, %v3437_v13 }
 0x519   :  { %v1619_v34 = vadd.f32 %v1618_v49, %v1610_v31 }
 0x51b   :  { %v1620_v23 = vadd.f32 %v1619_v34, %v1611_v29  ;;  %v3328_v41 = vpop.f32.mrb[10].mxu0  ;;  %v3332_v52 = vpop.f32.mrb[10].mxu1 }
 0x51c   :  { %v3330_v59 = vpop.f32.mrb[11].mxu0  ;;  %v3339_v4 = vpop.f32.mrb[11].mxu1 }
 0x51d   :  { %v1621_v14 = vadd.f32 %v1620_v23, %v1612_v54 }
 0x51f   :  { %v1622_v53 = vadd.f32 %v1621_v14, %v1613_v3  ;;  %v3334_v37 = vpop.f32.mrb[12].mxu0  ;;  %v3343_v28 = vpop.f32.mrb[12].mxu1 }
 0x520   :  { %v3341_v48 = vpop.f32.mrb[13].mxu0  ;;  %v3347_v18 = vpop.f32.mrb[13].mxu1 }
 0x521   :  { %1623 = vadd.xlane.f32.xlu1 %v1622_v53 }
 0x523   :  { %v3345_v17 = vpop.f32.mrb[14].mxu0 }
 0x524   :  { %v3349_v43 = vpop.f32.mrb[15].mxu0 }
 0x532   :  { %1690 = vperm.xlu1 %2361, %v1687_v19  }
 0x536   :  { %1717 = vperm.xlu1 %2361, %v1714_v38  }
 0x5ae   :  { %v1624_v25 = vpop.xlane.xlu1 %1623 }
 0x5af   :  { %v1625_v16 = vmul.f32 0.001953125, %v1624_v25 }
 0x5b1   :  { %v1626_v30 = vsub.f32 %v1315_v51, %v1625_v16  ;;  %v1627_v63 = vsub.f32 %v1317_v61, %v1625_v16  ;;  %v1628_v27 = vsub.f32 %v1386_v44, %v1625_v16  ;;  %v1629_v32 = vsub.f32 %v1388_v57, %v1625_v16 }
 0x5b2   :  { %v1630_v35 = vsub.f32 %v1457_v12, %v1625_v16  ;;  %v1631_v20 = vsub.f32 %v1459_v10, %v1625_v16  ;;  %v1632_v0 = vsub.f32 %v1528_v2, %v1625_v16  ;;  %v1633_v33 = vsub.f32 %v1530_v24, %v1625_v16 }
 0x5b3   :  { %v1636_v42 = vmul.f32 %v1626_v30, %v1626_v30  ;;  %v1637_v46 = vmul.f32 %v1627_v63, %v1627_v63  ;;  %v1638_v7 = vmul.f32 %v1628_v27, %v1628_v27  ;;  %v1639_v58 = vmul.f32 %v1629_v32, %v1629_v32 }
 0x5b4   :  { %v1640_v5 = vmul.f32 %v1630_v35, %v1630_v35  ;;  %v1641_v51 = vmul.f32 %v1631_v20, %v1631_v20  ;;  %v1634_v11 = vsub.f32 %v1599_v1, %v1625_v16  ;;  %v1642_v57 = vmul.f32 %v1632_v0, %v1632_v0 }
 0x5b5   :  { %v1646_v26 = vmul.f32 %v1636_v42, %v2915_v55  ;;  %v1647_v9 = vmul.f32 %v1637_v46, %v2917_v21  ;;  %v1648_v56 = vmul.f32 %v1638_v7, %v2921_v60  ;;  %v1649_v61 = vmul.f32 %v1639_v58, %v2923_v62 }
 0x5b6   :  { %v1650_v12 = vmul.f32 %v1640_v5, %v2925_v22  ;;  %v1635_v55 = vsub.f32 %v1601_v36, %v1625_v16  ;;  %v1643_v15 = vmul.f32 %v1633_v33, %v1633_v33  ;;  %v1651_v21 = vmul.f32 %v1641_v51, %v2928_v8 }
 0x5b7   :  { %v1656_v6 = vadd.f32 %v1647_v9, %v1646_v26  ;;  %v1644_v50 = vmul.f32 %v1634_v11, %v1634_v11  ;;  %v1652_v49 = vmul.f32 %v1642_v57, %v2936_v47  ;;  %v1670_v47 = vld [vmem:[%s3413_s6] sm:$0xff] }
 0x5b8   :  { %v1645_v2 = vmul.f32 %v1635_v55, %v1635_v55  ;;  %v1653_v31 = vmul.f32 %v1643_v15, %v2938_v39  ;;  %v1691_v39 = vpop.permute.xlu1 %1690 }
 0x5b9   :  { %v1657_v44 = vadd.f32 %v1656_v6, %v1648_v56  ;;  %v1654_v62 = vmul.f32 %v1644_v50, %v3436_v45 }
 0x5ba   :  { %v1655_v29 = vmul.f32 %v1645_v2, %v3437_v13 }
 0x5bb   :  { %v1658_v40 = vadd.f32 %v1657_v44, %v1649_v61 }
 0x5bc   :  { %v1718_v14 = vpop.permute.xlu1 %1717 }
 0x5bd   :  { %v1659_v10 = vadd.f32 %v1658_v40, %v1650_v12  ;;  %v1791_v45 = vadd.f32 %v3328_v41, %v1718_v14  ;;  %v1793_v13 = vadd.f32 %v3330_v59, %v1718_v14  ;;  %v1862_v53 = vadd.f32 %v3332_v52, %v1718_v14 }
 0x5be   :  { %v1864_v19 = vadd.f32 %v3339_v4, %v1718_v14  ;;  %v1933_v38 = vadd.f32 %v3334_v37, %v1718_v14  ;;  %v1935_v25 = vadd.f32 %v3341_v48, %v1718_v14  ;;  %v2004_v16 = vadd.f32 %v3343_v28, %v1718_v14 }
 0x5bf   :  { %v1660_v60 = vadd.f32 %v1659_v10, %v1651_v21  ;;  %v2006_v42 = vadd.f32 %v3347_v18, %v1718_v14  ;;  %v2075_v46 = vadd.f32 %v3345_v17, %v1718_v14  ;;  %v2077_v7 = vadd.f32 %v3349_v43, %v1718_v14 }
 0x5c1   :  { %v1661_v24 = vadd.f32 %v1660_v60, %v1652_v49 }
 0x5c3   :  { %v1662_v1 = vadd.f32 %v1661_v24, %v1653_v31 }
 0x5c5   :  { %v1663_v22 = vadd.f32 %v1662_v1, %v1654_v62 }
 0x5c7   :  { %v1664_v34 = vadd.f32 %v1663_v22, %v1655_v29 }
 0x5c9   :  { %1665 = vadd.xlane.f32.xlu0 %v1664_v34 }
 0x656   :  { %v1666_v36 = vpop.xlane.xlu0 %1665 }
 0x657   :  { %v1667_v54 = vmul.f32 0.001953125, %v1666_v36 }
 0x659   :  { %v1668_v8 = vadd.f32 1e-05, %v1667_v54 }
 0x65b   :  { %2454 = vrsqrt.f32 %v1668_v8 }
 0x665   :  { %v2455_v23 = vpop.eup %2454 }
 0x666   :  { %v1671_v3 = vmul.f32 %v2455_v23, %v1670_v47 }
 0x668   :  { %1674 = vperm.xlu0 %2360, %v1671_v3  }
 0x6e7   :  { %v1675_v26 = vpop.permute.xlu0 %1674 }
 0x6e8   :  { %v1677_v41 = vmul.f32 %v1675_v26, %v1626_v30  ;;  %v1678_v9 = vmul.f32 %v1675_v26, %v1627_v63  ;;  %v1679_v59 = vmul.f32 %v1675_v26, %v1628_v27  ;;  %v1680_v58 = vmul.f32 %v1675_v26, %v1629_v32 }
 0x6e9   :  { %v1681_v52 = vmul.f32 %v1675_v26, %v1630_v35  ;;  %v1682_v5 = vmul.f32 %v1675_v26, %v1631_v20  ;;  %v1683_v4 = vmul.f32 %v1675_v26, %v1632_v0  ;;  %v1684_v56 = vmul.f32 %v1675_v26, %v1633_v33 }
 0x6ea   :  { %v1685_v37 = vmul.f32 %v1675_v26, %v1634_v11  ;;  %v1686_v6 = vmul.f32 %v1675_v26, %v1635_v55  ;;  %v1693_v48 = vadd.f32 %v1691_v39, %v1677_v41  ;;  %v1694_v51 = vadd.f32 %v1691_v39, %v1678_v9 }
 0x6eb   :  { %v1695_v28 = vadd.f32 %v1691_v39, %v1679_v59  ;;  %v1696_v61 = vadd.f32 %v1691_v39, %v1680_v58  ;;  %v1697_v18 = vadd.f32 %v1691_v39, %v1681_v52  ;;  %v1698_v44 = vadd.f32 %v1691_v39, %v1682_v5 }
 0x6ec   :  { %v1699_v17 = vadd.f32 %v1691_v39, %v1683_v4  ;;  %v1700_v57 = vadd.f32 %v1691_v39, %v1684_v56  ;;  %v1701_v43 = vadd.f32 %v1691_v39, %v1685_v37  ;;  %v1702_v12 = vadd.f32 %v1691_v39, %v1686_v6 }
 0x6ed   :  { %v2079_v30 = vadd.f32 %v1791_v45, %v1693_v48  ;;  %v2080_v63 = vadd.f32 %v1793_v13, %v1694_v51  ;;  %v2081_v27 = vadd.f32 %v1862_v53, %v1695_v28  ;;  %v2082_v32 = vadd.f32 %v1864_v19, %v1696_v61 }
 0x6ee   :  { %v2083_v35 = vadd.f32 %v1933_v38, %v1697_v18  ;;  %v2084_v20 = vadd.f32 %v1935_v25, %v1698_v44  ;;  %v2085_v0 = vadd.f32 %v2004_v16, %v1699_v17  ;;  %v2086_v33 = vadd.f32 %v2006_v42, %v1700_v57 }
 0x6ef   :  { %v2087_v11 = vadd.f32 %v2075_v46, %v1701_v43  ;;  %v2088_v40 = vadd.f32 %v2077_v7, %v1702_v12  ;;  %v2089_v55 = vmax.f32 %v2079_v30, 0.0  ;;  %v2090_v15 = vmax.f32 %v2080_v63, 0.0 }
 0x6f0   :  { %v2091_v21 = vmax.f32 %v2081_v27, 0.0  ;;  %v2092_v10 = vmax.f32 %v2082_v32, 0.0  ;;  %v2093_v50 = vmax.f32 %v2083_v35, 0.0  ;;  %v2094_v49 = vmax.f32 %v2084_v20, 0.0 }
 0x6f1   :  { %v2095_v60 = vmax.f32 %v2085_v0, 0.0  ;;  %v2096_v2 = vmax.f32 %v2086_v33, 0.0  ;;  %v2097_v31 = vmax.f32 %v2087_v11, 0.0  ;;  %v2098_v24 = vmax.f32 %v2088_v40, 0.0  ;;  %2099 = vst [vmem:[%s3414_s10] sm:$0xff] %v2089_v55  ;;  %2100 = vst [vmem:[%s3414_s10 + $0x8] sm:$0xff] %v2090_v15 }
 0x6f2   :  { %2101 = vst [vmem:[%s3414_s10 + $0x10] sm:$0xff] %v2091_v21  ;;  %2102 = vst [vmem:[%s3414_s10 + $0x18] sm:$0xff] %v2092_v10 }
 0x6f3   :  { %2103 = vst [vmem:[%s3414_s10 + $0x20] sm:$0xff] %v2093_v50  ;;  %2104 = vst [vmem:[%s3414_s10 + $0x28] sm:$0xff] %v2094_v49 }
 0x6f4   :  { %2105 = vst [vmem:[%s3414_s10 + $0x30] sm:$0xff] %v2095_v60  ;;  %2106 = vst [vmem:[%s3414_s10 + $0x38] sm:$0xff] %v2096_v2 }
 0x6f5   :  { %2107 = vst [vmem:[%s3414_s10 + $0x40] sm:$0xff] %v2097_v31  ;;  %2108 = vst [vmem:[%s3414_s10 + $0x48] sm:$0xff] %v2098_v24 }

</bundles_post_ra>
